<compile_context>
chip_gen: v5e
topology: v5e:2x2
jax: 0.10.0
libtpu: 0.0.40
codegen_flags: <defaults>
</compile_context>

<pallas_src>
import math
import numpy as np
import jax
import jax.numpy as jnp
from jax.experimental import pallas as pl
from jax.experimental.pallas import tpu as pltpu


# =========================================================================
#  Parameter / derived-kernel setup (plain numpy glue, mirrors __init__)
# =========================================================================

def grid_sample_3d(inp, grid):
    """Trilinear F.grid_sample (align_corners=False, zeros padding).
    inp: (N, C, D, H, W); grid: (N, Do, Ho, Wo, 3) with last dim (x, y, z)."""
    N, C, D, H, W = inp.shape
    x, y, z = grid[..., 0], grid[..., 1], grid[..., 2]
    ix = ((x + 1.0) * W - 1.0) / 2.0
    iy = ((y + 1.0) * H - 1.0) / 2.0
    iz = ((z + 1.0) * D - 1.0) / 2.0
    ix0 = np.floor(ix).astype(np.int64); ix1 = ix0 + 1
    iy0 = np.floor(iy).astype(np.int64); iy1 = iy0 + 1
    iz0 = np.floor(iz).astype(np.int64); iz1 = iz0 + 1
    wx1 = ix - ix0; wx0 = 1.0 - wx1
    wy1 = iy - iy0; wy0 = 1.0 - wy1
    wz1 = iz - iz0; wz0 = 1.0 - wz1
    out = np.zeros((N, C) + x.shape[1:], dtype=np.float64)
    for zi, wz in ((iz0, wz0), (iz1, wz1)):
        for yi, wy in ((iy0, wy0), (iy1, wy1)):
            for xi, wx in ((ix0, wx0), (ix1, wx1)):
                valid = ((zi >= 0) & (zi < D) & (yi >= 0) & (yi < H)
                         & (xi >= 0) & (xi < W))
                zc = np.clip(zi, 0, D - 1)
                yc = np.clip(yi, 0, H - 1)
                xc = np.clip(xi, 0, W - 1)
                wgt = (wz * wy * wx) * valid
                for n in range(N):
                    out[n] += inp[n][:, zc[n], yc[n], xc[n]] * wgt[n][None]
    return out


def _make_grid(sizes, sf, n_repeat):
    gz, gy, gx = np.meshgrid(
        np.linspace(-1.0, 1.0, sizes[0]) * sf ** 2,
        np.linspace(-1.0, 1.0, sizes[1]) * sf,
        np.linspace(-1.0, 1.0, sizes[2]) * sf,
        indexing="ij")
    grid = np.stack([gx, gy, gz], axis=-1)[None]
    return np.repeat(grid, n_repeat, axis=0)


def shrink_kernel(kernel, up_scale):
    up_scale = float(up_scale)
    pad_in = int(np.ceil(up_scale ** 2)) * ((kernel.shape[2] - 1) // 2)
    pad_h = int(np.ceil(up_scale)) * ((kernel.shape[3] - 1) // 2)
    pad_w = int(np.ceil(up_scale)) * ((kernel.shape[4] - 1) // 2)
    padded = np.pad(kernel, ((0, 0), (0, 0), (pad_in, pad_in),
                             (pad_h, pad_h), (pad_w, pad_w)))
    delta = up_scale % 1
    if delta == 0:
        sf = 1.0
    else:
        sf = (kernel.shape[4] - 1) / (padded.shape[-1] - 1) * (up_scale + 1)
        sf = 1.5 * (sf - 0.5) ** 3 + 0.57
    grid = _make_grid((kernel.shape[2], kernel.shape[3], kernel.shape[4]),
                      sf, kernel.shape[0])
    new_kernel = grid_sample_3d(padded, grid)
    if kernel.shape[-1] - 2 * up_scale > 0:
        new_kernel = new_kernel * (kernel.shape[-1] ** 2 /
                                   ((kernel.shape[-1] - 2 * up_scale) ** 2 + 0.01))
    return new_kernel


def dilate_kernel(kernel, dilation):
    if dilation == 0:
        return kernel
    dilation = float(dilation)
    delta = dilation % 1
    d_in = int(np.ceil(dilation ** 2))
    new_in = kernel.shape[2] + (kernel.shape[2] - 1) * d_in
    d_h = int(np.ceil(dilation))
    new_h = kernel.shape[3] + (kernel.shape[3] - 1) * d_h
    d_w = int(np.ceil(dilation))
    new_w = kernel.shape[4] + (kernel.shape[4] - 1) * d_h
    new_kernel = np.zeros((kernel.shape[0], kernel.shape[1], new_in, new_h, new_w),
                          dtype=np.float64)
    new_kernel[:, :, ::d_in + 1, ::d_h + 1, ::d_w + 1] = kernel
    if delta != 0:
        p = (kernel.shape[4] - 1) // 2
        new_kernel = np.pad(new_kernel, ((0, 0), (0, 0), (p, p), (p, p), (p, p)))
        sf = ((new_kernel.shape[-1] - 1 - (kernel.shape[4] - 1) * delta)
              / (new_kernel.shape[-1] - 1))
        grid = _make_grid((new_in, new_h, new_w), sf, kernel.shape[0])
        new_kernel = grid_sample_3d(new_kernel, grid)
    return new_kernel[:, :, -kernel.shape[2]:]


def kernel_generation(comb_w, weights, sout):
    """Reproduces Relaxed_Scale_GroupConv2d.kernel_generation (numpy)."""
    relaxed = np.einsum("nf,fabcde->nabcde", comb_w.astype(np.float64),
                        weights.astype(np.float64))
    out = []
    for s in range(sout):
        if s - sout // 2 < 0:
            nk = shrink_kernel(relaxed[s], (sout // 2 - s) / 2)
        elif s - sout // 2 > 0:
            nk = dilate_kernel(relaxed[s], (s - sout // 2) / 2)
        else:
            nk = relaxed[s]
        nk = np.transpose(nk, (0, 2, 1, 3, 4))                 # swap dims 1,2
        nk = nk.reshape(nk.shape[0], -1, nk.shape[3], nk.shape[4])
        out.append(nk.astype(np.float32))                      # (O, I, KH, KW)
    return out


def gaussian_kernel_3d(size, sigma):
    """Mirrors gaussain_blur.gaussian_kernel (dim=3, channels=1)."""
    ks = 2 * int(size) + 1
    grids = np.meshgrid(*([np.arange(ks, dtype=np.float64)] * 3), indexing="ij")
    kernel = np.array(1.0, dtype=np.float64)
    for std, mgrid in zip(sigma, grids):
        mean = (ks - 1) / 2.0
        kernel = kernel * (1.0 / (std * math.sqrt(2 * math.pi))
                           * np.exp(-((mgrid - mean) / (2 * std)) ** 2))
    kernel = kernel / kernel.sum()
    return kernel.astype(np.float32)                           # (3, 3, 3)


# =========================================================================
#  Pallas kernel: fused conv-as-matmul (+ optional bias, + BN(train) + ReLU)
# =========================================================================

def make_conv_kernel(*, bn_relu, has_bias, eps=1e-5):
    """Blocks seen by the kernel (leading grid axis indexed away with [0]):
         x_ref: (1, K, N)     im2col activations, N = B*H*W lane-dense
         w_ref: (1, Cout, K)
         b_ref: (1, Cout, 1)  (only when has_bias)
         o_ref: (1, Cout, N)
    """
    def kernel(*refs):
        if has_bias:
            x_ref, w_ref, b_ref, o_ref = refs
        else:
            x_ref, w_ref, o_ref = refs
        # Single fused-K MXU matmul: (Cout, K) @ (K, N) -> (Cout, N), lane-dense N.
        y = jnp.dot(w_ref[0], x_ref[0], preferred_element_type=jnp.float32)
        if has_bias:
            y = y + b_ref[0]
        if bn_relu:
            # BatchNorm2d (training mode): stats over (N, H, W) == lane axis,
            # gamma=1, beta=0, biased variance.  Centered formulation matches
            # PyTorch numerics at identical VALU cost.
            mean = jnp.mean(y, axis=1, keepdims=True)
            d = y - mean
            var = jnp.mean(d * d, axis=1, keepdims=True)
            y = d * jax.lax.rsqrt(var + eps)
            y = jnp.maximum(y, 0.0)                            # ReLU
        o_ref[0] = y
    return kernel


def conv_matmul_pallas(xs, w, bias=None, *, bn_relu, eps=1e-5):
    """Run the fused conv kernel over a leading 'group' axis (scale levels).

    xs:   (G, K, N) f32   im2col'd activations (N = B*H*W, lane-dense)
    w:    (G, Cout, K) f32
    bias: (G, Cout, 1) f32 or None
    returns (G, Cout, N) f32
    """
    G, K, N = xs.shape
    Cout = w.shape[1]
    in_specs = [pl.BlockSpec((1, K, N), lambda g: (g, 0, 0)),
                pl.BlockSpec((1, Cout, K), lambda g: (g, 0, 0))]
    args = [xs, w]
    if bias is not None:
        in_specs.append(pl.BlockSpec((1, Cout, 1), lambda g: (g, 0, 0)))
        args.append(bias)
    return pl.pallas_call(
        make_conv_kernel(bn_relu=bn_relu, has_bias=bias is not None, eps=eps),
        out_shape=jax.ShapeDtypeStruct((G, Cout, N), jnp.float32),
        grid=(G,),
        in_specs=in_specs,
        out_specs=pl.BlockSpec((1, Cout, N), lambda g: (g, 0, 0)),
        compiler_params=pltpu.CompilerParams(
            dimension_semantics=("parallel",)),
    )(*args)


# =========================================================================
#  Layout glue (XLA): channel-major im2col + weight repacking
# =========================================================================

def im2col_cm(x_cbhw, KH, KW):
    """'same'-padded im2col of a channel-major (C, B, H, W) activation into the
    lane-dense (KH*KW*C, B*H*W) layout.  No transposes (layout is kept
    channel-major between layers)."""
    C, B, H, W = x_cbhw.shape
    ph, pw = (KH - 1) // 2, (KW - 1) // 2
    xp = jnp.pad(x_cbhw, ((0, 0), (0, 0), (ph, ph), (pw, pw)))
    rows = [xp[:, :, kh:kh + H, kw:kw + W].reshape(C, B * H * W)
            for kh in range(KH) for kw in range(KW)]
    return jnp.concatenate(rows, axis=0)                        # (KH*KW*C, BHW)


def to_cm(y_cn, B, H, W):
    """(C, B*H*W) -> channel-major (C, B, H, W)."""
    return y_cn.reshape(y_cn.shape[0], B, H, W)


def to_w2d(w_oihw):
    """(O, I, KH, KW) conv weight -> (O, KH*KW*I); column order is tap-major
    (kh, kw, cin) to match the im2col_cm row ordering."""
    O, I, KH, KW = w_oihw.shape
    return np.transpose(w_oihw, (0, 2, 3, 1)).reshape(O, KH * KW * I)


def blur_as_conv_w2d(kern3d, channels, scale):
    """Express the 3-D gaussian blur (padding 1 along C, H, W) as a channel-
    mixing 2-D conv with a tridiagonal (C, C, 3, 3) weight so it rides the MXU
    through the same fused conv kernel; `scale` folds the (s+1)=2 factor."""
    KD, KH, KW = kern3d.shape
    w = np.zeros((channels, channels, KH, KW), np.float32)
    for o in range(channels):
        for dd in range(KD):
            i = o + dd - (KD - 1) // 2
            if 0 <= i < channels:
                w[o, i] = kern3d[dd]
    return to_w2d(w * np.float32(scale))


# =========================================================================
#  The full network
# =========================================================================

class RelaxedScaleGroupConvNetPallas:
    def __init__(self, in_channels, out_channels, hidden_dim, kernel_size,
                 num_layers, num_scales, num_filters, seed=0):
        # blur_input always produces 3 scale branches -> forward needs num_scales==3
        assert num_scales == 3
        self.num_scales = num_scales
        self.hidden_dim = hidden_dim
        self.kernel_size = kernel_size
        self.out_channels = out_channels
        rng = np.random.default_rng(seed)

        # per-level input scaling; level 2's (s+1)=2 factor is folded into the
        # blur weights, levels 0/1 into the first conv-layer weights (exact).
        level_scale = [0.5, 1.0, 1.0]

        # per layer: list over levels of repacked (Cout, KH*KW*Cin) weights
        self.layers2d = []
        cin = in_channels
        for li in range(num_layers - 1):
            stdv = math.sqrt(1.0 / (kernel_size * kernel_size * cin))
            w = rng.uniform(-stdv, stdv,
                            size=(num_filters, hidden_dim, 2, cin // 2,
                                  kernel_size, kernel_size)).astype(np.float32)
            comb = np.ones((num_scales, num_filters), np.float32) / num_filters
            per_level = kernel_generation(comb, w, num_scales)   # [(O,I,KH,KW)]
            entry = []
            for l, k in enumerate(per_level):
                kk = k * (level_scale[l] if li == 0 else 1.0)
                entry.append(dict(w2d=jnp.asarray(to_w2d(kk), jnp.float32),
                                  KH=int(k.shape[2]), KW=int(k.shape[3])))
            self.layers2d.append(entry)
            cin = hidden_dim
        # NOTE: Relaxed_Scale_GroupConv2d declares a bias but never applies it
        # in forward (F.conv2d without bias), so no hidden-layer bias here.

        # final plain conv (with bias, no BN/ReLU)
        fin_in = hidden_dim * num_scales
        fb = 1.0 / math.sqrt(fin_in * kernel_size * kernel_size)
        fw = rng.uniform(-fb, fb, size=(out_channels, fin_in,
                                        kernel_size, kernel_size)).astype(np.float32)
        self.final_w2d = jnp.asarray(to_w2d(fw), jnp.float32)
        self.final_b = jnp.asarray(
            rng.uniform(-fb, fb, size=(out_channels,)), jnp.float32)

        # gaussian blur for the s=+1 branch (size=1, sigma=[1,1,1], dim=3),
        # folded with the (s+1)=2 scale, expressed as a 2-D conv weight.
        kern3d = gaussian_kernel_3d(1, [1.0, 1.0, 1.0])
        self.blur_w2d = jnp.asarray(
            blur_as_conv_w2d(kern3d, in_channels, 2.0), jnp.float32)
        self.blur_khw = (int(kern3d.shape[1]), int(kern3d.shape[2]))

    # -- helpers -----------------------------------------------------------
    @staticmethod
    def _group_levels(entries):
        """Group scale levels with identical conv geometry (levels 0 & 1 here)
        so they share one pallas_call with a 'parallel' grid axis."""
        groups = []
        for l, e in enumerate(entries):
            sig = (tuple(e["w2d"].shape), e["KH"], e["KW"])
            for g in groups:
                if g[0] == sig:
                    g[1].append(l)
                    break
            else:
                groups.append((sig, [l]))
        return [g[1] for g in groups]

    # -- forward -----------------------------------------------------------
    def __call__(self, x_nchw):
        B, _, H, W = x_nchw.shape
        # one transpose in: channel-major (C, B, H, W) layout for all glue
        x_cm = jnp.transpose(x_nchw.astype(jnp.float32), (1, 0, 2, 3))

        # blur_input: level 0 = 0.5*x, level 1 = x, level 2 = 2*blur3d(x)
        # (0.5 / 1.0 folded into first-layer weights; 2.0 folded into blur_w2d)
        kh, kw = self.blur_khw
        xs_blur = im2col_cm(x_cm, kh, kw)[None]                  # (1, 9*Cin, BHW)
        blur = conv_matmul_pallas(xs_blur, self.blur_w2d[None], bn_relu=False)
        h_levels = [x_cm, x_cm, to_cm(blur[0], B, H, W)]

        # stack of Relaxed_Scale_GroupConv2d layers (conv -> BN(train) -> ReLU)
        for entries in self.layers2d:
            new_h = [None] * self.num_scales
            for levels in self._group_levels(entries):
                xs = jnp.stack(
                    [im2col_cm(h_levels[l], entries[l]["KH"],
                               entries[l]["KW"]) for l in levels], axis=0)
                wg = jnp.stack([entries[l]["w2d"] for l in levels], axis=0)
                out = conv_matmul_pallas(xs, wg, bn_relu=True)
                for gi, l in enumerate(levels):
                    new_h[l] = to_cm(out[gi], B, H, W)
            h_levels = new_h

        # channel-concat of the 3 level features + final conv (bias, no BN/ReLU)
        cat = jnp.concatenate(h_levels, axis=0)                  # (3*hid, B, H, W)
        xs_f = im2col_cm(cat, self.kernel_size, self.kernel_size)[None]
        out_f = conv_matmul_pallas(xs_f, self.final_w2d[None],
                                   bias=self.final_b.reshape(1, -1, 1),
                                   bn_relu=False)
        # one transpose out: (Cout, B, H, W) -> NCHW
        return jnp.transpose(to_cm(out_f[0], B, H, W), (1, 0, 2, 3))


# =========================================================================

if __name__ == "__main__":
    B, Cin, H, W = 2, 4, 16, 16
    model = RelaxedScaleGroupConvNetPallas(
        in_channels=Cin, out_channels=4, hidden_dim=8, kernel_size=3,
        num_layers=3, num_scales=3, num_filters=2, seed=0)

    x = jax.random.normal(jax.random.PRNGKey(0), (B, Cin, H, W), jnp.float32)

    fwd = jax.jit(model.__call__)
    y = jax.block_until_ready(fwd(x))
    assert y.shape == (B, 4, H, W), y.shape
    assert bool(jnp.all(jnp.isfinite(y)))
    print("KERNEL_OK")
</pallas_src>

<mosaic_0001>
module attributes {stable_mosaic.version = 11 : i64} {
  func.func @kernel(%arg0: i32, %arg1: memref<1x36x512xf32, #tpu.memory_space<vmem>>, %arg2: memref<1x4x36xf32, #tpu.memory_space<vmem>>, %arg3: memref<1x4x512xf32, #tpu.memory_space<vmem>>) attributes {dimension_semantics = [#tpu.dimension_semantics<parallel>], iteration_bounds = array<i64: 1>, scalar_prefetch = 0 : i64, scratch_operands = 0 : i64, tpu.core_type = #tpu.core_type<tc>, window_params = [{transform_indices = @transform_0, window_bounds = array<i64: 1, 36, 512>}, {transform_indices = @transform_1, window_bounds = array<i64: 1, 4, 36>}, {transform_indices = @transform_2, window_bounds = array<i64: 1, 4, 512>}]} {
    %c0 = arith.constant 0 : index
    %c0_0 = arith.constant 0 : index
    %c0_1 = arith.constant 0 : index
    %0 = vector.load %arg2[%c0, %c0_0, %c0_1] : memref<1x4x36xf32, #tpu.memory_space<vmem>>, vector<1x4x36xf32>
    %1 = vector.shape_cast %0 : vector<1x4x36xf32> to vector<4x36xf32>
    %c0_2 = arith.constant 0 : index
    %c0_3 = arith.constant 0 : index
    %c0_4 = arith.constant 0 : index
    %2 = vector.load %arg1[%c0_2, %c0_3, %c0_4] : memref<1x36x512xf32, #tpu.memory_space<vmem>>, vector<1x36x512xf32>
    %3 = vector.shape_cast %2 : vector<1x36x512xf32> to vector<36x512xf32>
    %cst = arith.constant dense<0.000000e+00> : vector<4x512xf32>
    %4 = tpu.matmul %1, %3, %cst {dimension_numbers = #tpu.dot_dimension_numbers<[1], [0], [0], [1], [0, 0, 1, 1], [], []>} : vector<4x36xf32>, vector<36x512xf32>, vector<4x512xf32> -> vector<4x512xf32>
    %c0_5 = arith.constant 0 : index
    %c0_6 = arith.constant 0 : index
    %c0_7 = arith.constant 0 : index
    %5 = vector.load %arg3[%c0_5, %c0_6, %c0_7] : memref<1x4x512xf32, #tpu.memory_space<vmem>>, vector<1x4x512xf32>
    %6 = vector.shape_cast %5 : vector<1x4x512xf32> to vector<4x512xf32>
    %7 = vector.shape_cast %4 : vector<4x512xf32> to vector<1x4x512xf32>
    tpu.vector_store %arg3[%c0_5, %c0_6, %c0_7], %7 {strides = array<i32>} : memref<1x4x512xf32, #tpu.memory_space<vmem>>, vector<1x4x512xf32>,
    return
  }
  func.func @transform_0(%arg0: i32) -> (i32, i32, i32) {
    %c0_i32 = arith.constant 0 : i32
    %c0_i32_0 = arith.constant 0 : i32
    %c0_i32_1 = arith.constant 0 : i32
    return %arg0, %c0_i32, %c0_i32_0 : i32, i32, i32
  }
  func.func @transform_1(%arg0: i32) -> (i32, i32, i32) {
    %c0_i32 = arith.constant 0 : i32
    %c0_i32_0 = arith.constant 0 : i32
    %c0_i32_1 = arith.constant 0 : i32
    return %arg0, %c0_i32, %c0_i32_0 : i32, i32, i32
  }
  func.func @transform_2(%arg0: i32) -> (i32, i32, i32) {
    %c0_i32 = arith.constant 0 : i32
    %c0_i32_0 = arith.constant 0 : i32
    %c0_i32_1 = arith.constant 0 : i32
    return %arg0, %c0_i32, %c0_i32_0 : i32, i32, i32
  }
}

module attributes {stable_mosaic.version = 11 : i64} {
  func.func @kernel(%arg0: i32, %arg1: memref<1x36x512xf32, #tpu.memory_space<vmem>>, %arg2: memref<1x8x36xf32, #tpu.memory_space<vmem>>, %arg3: memref<1x8x512xf32, #tpu.memory_space<vmem>>) attributes {dimension_semantics = [#tpu.dimension_semantics<parallel>], iteration_bounds = array<i64: 2>, scalar_prefetch = 0 : i64, scratch_operands = 0 : i64, tpu.core_type = #tpu.core_type<tc>, window_params = [{transform_indices = @transform_0, window_bounds = array<i64: 1, 36, 512>}, {transform_indices = @transform_1, window_bounds = array<i64: 1, 8, 36>}, {transform_indices = @transform_2, window_bounds = array<i64: 1, 8, 512>}]} {
    %c0 = arith.constant 0 : index
    %c0_0 = arith.constant 0 : index
    %c0_1 = arith.constant 0 : index
    %0 = vector.load %arg2[%c0, %c0_0, %c0_1] : memref<1x8x36xf32, #tpu.memory_space<vmem>>, vector<1x8x36xf32>
    %1 = vector.shape_cast %0 : vector<1x8x36xf32> to vector<8x36xf32>
    %c0_2 = arith.constant 0 : index
    %c0_3 = arith.constant 0 : index
    %c0_4 = arith.constant 0 : index
    %2 = vector.load %arg1[%c0_2, %c0_3, %c0_4] : memref<1x36x512xf32, #tpu.memory_space<vmem>>, vector<1x36x512xf32>
    %3 = vector.shape_cast %2 : vector<1x36x512xf32> to vector<36x512xf32>
    %cst = arith.constant dense<0.000000e+00> : vector<8x512xf32>
    %4 = tpu.matmul %1, %3, %cst {dimension_numbers = #tpu.dot_dimension_numbers<[1], [0], [0], [1], [0, 0, 1, 1], [], []>} : vector<8x36xf32>, vector<36x512xf32>, vector<8x512xf32> -> vector<8x512xf32>
    %cst_5 = arith.constant dense<0.000000e+00> : vector<8xf32>
    %5 = vector.multi_reduction <add>, %4, %cst_5 [1] : vector<8x512xf32> to vector<8xf32>
    %6 = vector.shape_cast %5 : vector<8xf32> to vector<8x1xf32>
    %cst_6 = arith.constant 5.120000e+02 : f32
    %7 = vector.broadcast %cst_6 : f32 to vector<8x1xf32>
    %8 = arith.divf %6, %7 : vector<8x1xf32>
    %9 = vector.broadcast %8 : vector<8x1xf32> to vector<8x512xf32>
    %10 = arith.subf %4, %9 : vector<8x512xf32>
    %11 = arith.mulf %10, %10 : vector<8x512xf32>
    %cst_7 = arith.constant dense<0.000000e+00> : vector<8xf32>
    %12 = vector.multi_reduction <add>, %11, %cst_7 [1] : vector<8x512xf32> to vector<8xf32>
    %13 = vector.shape_cast %12 : vector<8xf32> to vector<8x1xf32>
    %cst_8 = arith.constant 5.120000e+02 : f32
    %14 = vector.broadcast %cst_8 : f32 to vector<8x1xf32>
    %15 = arith.divf %13, %14 : vector<8x1xf32>
    %cst_9 = arith.constant 9.99999974E-6 : f32
    %16 = vector.broadcast %cst_9 : f32 to vector<8x1xf32>
    %17 = arith.addf %15, %16 : vector<8x1xf32>
    %18 = math.rsqrt %17 : vector<8x1xf32>
    %19 = vector.broadcast %18 : vector<8x1xf32> to vector<8x512xf32>
    %20 = arith.mulf %10, %19 : vector<8x512xf32>
    %cst_10 = arith.constant 0.000000e+00 : f32
    %21 = vector.broadcast %cst_10 : f32 to vector<8x512xf32>
    %22 = arith.maximumf %20, %21 : vector<8x512xf32>
    %c0_11 = arith.constant 0 : index
    %c0_12 = arith.constant 0 : index
    %c0_13 = arith.constant 0 : index
    %23 = vector.load %arg3[%c0_11, %c0_12, %c0_13] : memref<1x8x512xf32, #tpu.memory_space<vmem>>, vector<1x8x512xf32>
    %24 = vector.shape_cast %23 : vector<1x8x512xf32> to vector<8x512xf32>
    %25 = vector.shape_cast %22 : vector<8x512xf32> to vector<1x8x512xf32>
    tpu.vector_store %arg3[%c0_11, %c0_12, %c0_13], %25 {strides = array<i32>} : memref<1x8x512xf32, #tpu.memory_space<vmem>>, vector<1x8x512xf32>,
    return
  }
  func.func @transform_0(%arg0: i32) -> (i32, i32, i32) {
    %c0_i32 = arith.constant 0 : i32
    %c0_i32_0 = arith.constant 0 : i32
    %c0_i32_1 = arith.constant 0 : i32
    return %arg0, %c0_i32, %c0_i32_0 : i32, i32, i32
  }
  func.func @transform_1(%arg0: i32) -> (i32, i32, i32) {
    %c0_i32 = arith.constant 0 : i32
    %c0_i32_0 = arith.constant 0 : i32
    %c0_i32_1 = arith.constant 0 : i32
    return %arg0, %c0_i32, %c0_i32_0 : i32, i32, i32
  }
  func.func @transform_2(%arg0: i32) -> (i32, i32, i32) {
    %c0_i32 = arith.constant 0 : i32
    %c0_i32_0 = arith.constant 0 : i32
    %c0_i32_1 = arith.constant 0 : i32
    return %arg0, %c0_i32, %c0_i32_0 : i32, i32, i32
  }
}

module attributes {stable_mosaic.version = 11 : i64} {
  func.func @kernel(%arg0: i32, %arg1: memref<1x72x512xf32, #tpu.memory_space<vmem>>, %arg2: memref<1x8x72xf32, #tpu.memory_space<vmem>>, %arg3: memref<1x8x512xf32, #tpu.memory_space<vmem>>) attributes {dimension_semantics = [#tpu.dimension_semantics<parallel>], iteration_bounds = array<i64: 2>, scalar_prefetch = 0 : i64, scratch_operands = 0 : i64, tpu.core_type = #tpu.core_type<tc>, window_params = [{transform_indices = @transform_0, window_bounds = array<i64: 1, 72, 512>}, {transform_indices = @transform_1, window_bounds = array<i64: 1, 8, 72>}, {transform_indices = @transform_2, window_bounds = array<i64: 1, 8, 512>}]} {
    %c0 = arith.constant 0 : index
    %c0_0 = arith.constant 0 : index
    %c0_1 = arith.constant 0 : index
    %0 = vector.load %arg2[%c0, %c0_0, %c0_1] : memref<1x8x72xf32, #tpu.memory_space<vmem>>, vector<1x8x72xf32>
    %1 = vector.shape_cast %0 : vector<1x8x72xf32> to vector<8x72xf32>
    %c0_2 = arith.constant 0 : index
    %c0_3 = arith.constant 0 : index
    %c0_4 = arith.constant 0 : index
    %2 = vector.load %arg1[%c0_2, %c0_3, %c0_4] : memref<1x72x512xf32, #tpu.memory_space<vmem>>, vector<1x72x512xf32>
    %3 = vector.shape_cast %2 : vector<1x72x512xf32> to vector<72x512xf32>
    %cst = arith.constant dense<0.000000e+00> : vector<8x512xf32>
    %4 = tpu.matmul %1, %3, %cst {dimension_numbers = #tpu.dot_dimension_numbers<[1], [0], [0], [1], [0, 0, 1, 1], [], []>} : vector<8x72xf32>, vector<72x512xf32>, vector<8x512xf32> -> vector<8x512xf32>
    %cst_5 = arith.constant dense<0.000000e+00> : vector<8xf32>
    %5 = vector.multi_reduction <add>, %4, %cst_5 [1] : vector<8x512xf32> to vector<8xf32>
    %6 = vector.shape_cast %5 : vector<8xf32> to vector<8x1xf32>
    %cst_6 = arith.constant 5.120000e+02 : f32
    %7 = vector.broadcast %cst_6 : f32 to vector<8x1xf32>
    %8 = arith.divf %6, %7 : vector<8x1xf32>
    %9 = vector.broadcast %8 : vector<8x1xf32> to vector<8x512xf32>
    %10 = arith.subf %4, %9 : vector<8x512xf32>
    %11 = arith.mulf %10, %10 : vector<8x512xf32>
    %cst_7 = arith.constant dense<0.000000e+00> : vector<8xf32>
    %12 = vector.multi_reduction <add>, %11, %cst_7 [1] : vector<8x512xf32> to vector<8xf32>
    %13 = vector.shape_cast %12 : vector<8xf32> to vector<8x1xf32>
    %cst_8 = arith.constant 5.120000e+02 : f32
    %14 = vector.broadcast %cst_8 : f32 to vector<8x1xf32>
    %15 = arith.divf %13, %14 : vector<8x1xf32>
    %cst_9 = arith.constant 9.99999974E-6 : f32
    %16 = vector.broadcast %cst_9 : f32 to vector<8x1xf32>
    %17 = arith.addf %15, %16 : vector<8x1xf32>
    %18 = math.rsqrt %17 : vector<8x1xf32>
    %19 = vector.broadcast %18 : vector<8x1xf32> to vector<8x512xf32>
    %20 = arith.mulf %10, %19 : vector<8x512xf32>
    %cst_10 = arith.constant 0.000000e+00 : f32
    %21 = vector.broadcast %cst_10 : f32 to vector<8x512xf32>
    %22 = arith.maximumf %20, %21 : vector<8x512xf32>
    %c0_11 = arith.constant 0 : index
    %c0_12 = arith.constant 0 : index
    %c0_13 = arith.constant 0 : index
    %23 = vector.load %arg3[%c0_11, %c0_12, %c0_13] : memref<1x8x512xf32, #tpu.memory_space<vmem>>, vector<1x8x512xf32>
    %24 = vector.shape_cast %23 : vector<1x8x512xf32> to vector<8x512xf32>
    %25 = vector.shape_cast %22 : vector<8x512xf32> to vector<1x8x512xf32>
    tpu.vector_store %arg3[%c0_11, %c0_12, %c0_13], %25 {strides = array<i32>} : memref<1x8x512xf32, #tpu.memory_space<vmem>>, vector<1x8x512xf32>,
    return
  }
  func.func @transform_0(%arg0: i32) -> (i32, i32, i32) {
    %c0_i32 = arith.constant 0 : i32
    %c0_i32_0 = arith.constant 0 : i32
    %c0_i32_1 = arith.constant 0 : i32
    return %arg0, %c0_i32, %c0_i32_0 : i32, i32, i32
  }
  func.func @transform_1(%arg0: i32) -> (i32, i32, i32) {
    %c0_i32 = arith.constant 0 : i32
    %c0_i32_0 = arith.constant 0 : i32
    %c0_i32_1 = arith.constant 0 : i32
    return %arg0, %c0_i32, %c0_i32_0 : i32, i32, i32
  }
  func.func @transform_2(%arg0: i32) -> (i32, i32, i32) {
    %c0_i32 = arith.constant 0 : i32
    %c0_i32_0 = arith.constant 0 : i32
    %c0_i32_1 = arith.constant 0 : i32
    return %arg0, %c0_i32, %c0_i32_0 : i32, i32, i32
  }
}

module attributes {stable_mosaic.version = 11 : i64} {
  func.func @kernel(%arg0: i32, %arg1: memref<1x100x512xf32, #tpu.memory_space<vmem>>, %arg2: memref<1x8x100xf32, #tpu.memory_space<vmem>>, %arg3: memref<1x8x512xf32, #tpu.memory_space<vmem>>) attributes {dimension_semantics = [#tpu.dimension_semantics<parallel>], iteration_bounds = array<i64: 1>, scalar_prefetch = 0 : i64, scratch_operands = 0 : i64, tpu.core_type = #tpu.core_type<tc>, window_params = [{transform_indices = @transform_0, window_bounds = array<i64: 1, 100, 512>}, {transform_indices = @transform_1, window_bounds = array<i64: 1, 8, 100>}, {transform_indices = @transform_2, window_bounds = array<i64: 1, 8, 512>}]} {
    %c0 = arith.constant 0 : index
    %c0_0 = arith.constant 0 : index
    %c0_1 = arith.constant 0 : index
    %0 = vector.load %arg2[%c0, %c0_0, %c0_1] : memref<1x8x100xf32, #tpu.memory_space<vmem>>, vector<1x8x100xf32>
    %1 = vector.shape_cast %0 : vector<1x8x100xf32> to vector<8x100xf32>
    %c0_2 = arith.constant 0 : index
    %c0_3 = arith.constant 0 : index
    %c0_4 = arith.constant 0 : index
    %2 = vector.load %arg1[%c0_2, %c0_3, %c0_4] : memref<1x100x512xf32, #tpu.memory_space<vmem>>, vector<1x100x512xf32>
    %3 = vector.shape_cast %2 : vector<1x100x512xf32> to vector<100x512xf32>
    %cst = arith.constant dense<0.000000e+00> : vector<8x512xf32>
    %4 = tpu.matmul %1, %3, %cst {dimension_numbers = #tpu.dot_dimension_numbers<[1], [0], [0], [1], [0, 0, 1, 1], [], []>} : vector<8x100xf32>, vector<100x512xf32>, vector<8x512xf32> -> vector<8x512xf32>
    %cst_5 = arith.constant dense<0.000000e+00> : vector<8xf32>
    %5 = vector.multi_reduction <add>, %4, %cst_5 [1] : vector<8x512xf32> to vector<8xf32>
    %6 = vector.shape_cast %5 : vector<8xf32> to vector<8x1xf32>
    %cst_6 = arith.constant 5.120000e+02 : f32
    %7 = vector.broadcast %cst_6 : f32 to vector<8x1xf32>
    %8 = arith.divf %6, %7 : vector<8x1xf32>
    %9 = vector.broadcast %8 : vector<8x1xf32> to vector<8x512xf32>
    %10 = arith.subf %4, %9 : vector<8x512xf32>
    %11 = arith.mulf %10, %10 : vector<8x512xf32>
    %cst_7 = arith.constant dense<0.000000e+00> : vector<8xf32>
    %12 = vector.multi_reduction <add>, %11, %cst_7 [1] : vector<8x512xf32> to vector<8xf32>
    %13 = vector.shape_cast %12 : vector<8xf32> to vector<8x1xf32>
    %cst_8 = arith.constant 5.120000e+02 : f32
    %14 = vector.broadcast %cst_8 : f32 to vector<8x1xf32>
    %15 = arith.divf %13, %14 : vector<8x1xf32>
    %cst_9 = arith.constant 9.99999974E-6 : f32
    %16 = vector.broadcast %cst_9 : f32 to vector<8x1xf32>
    %17 = arith.addf %15, %16 : vector<8x1xf32>
    %18 = math.rsqrt %17 : vector<8x1xf32>
    %19 = vector.broadcast %18 : vector<8x1xf32> to vector<8x512xf32>
    %20 = arith.mulf %10, %19 : vector<8x512xf32>
    %cst_10 = arith.constant 0.000000e+00 : f32
    %21 = vector.broadcast %cst_10 : f32 to vector<8x512xf32>
    %22 = arith.maximumf %20, %21 : vector<8x512xf32>
    %c0_11 = arith.constant 0 : index
    %c0_12 = arith.constant 0 : index
    %c0_13 = arith.constant 0 : index
    %23 = vector.load %arg3[%c0_11, %c0_12, %c0_13] : memref<1x8x512xf32, #tpu.memory_space<vmem>>, vector<1x8x512xf32>
    %24 = vector.shape_cast %23 : vector<1x8x512xf32> to vector<8x512xf32>
    %25 = vector.shape_cast %22 : vector<8x512xf32> to vector<1x8x512xf32>
    tpu.vector_store %arg3[%c0_11, %c0_12, %c0_13], %25 {strides = array<i32>} : memref<1x8x512xf32, #tpu.memory_space<vmem>>, vector<1x8x512xf32>,
    return
  }
  func.func @transform_0(%arg0: i32) -> (i32, i32, i32) {
    %c0_i32 = arith.constant 0 : i32
    %c0_i32_0 = arith.constant 0 : i32
    %c0_i32_1 = arith.constant 0 : i32
    return %arg0, %c0_i32, %c0_i32_0 : i32, i32, i32
  }
  func.func @transform_1(%arg0: i32) -> (i32, i32, i32) {
    %c0_i32 = arith.constant 0 : i32
    %c0_i32_0 = arith.constant 0 : i32
    %c0_i32_1 = arith.constant 0 : i32
    return %arg0, %c0_i32, %c0_i32_0 : i32, i32, i32
  }
  func.func @transform_2(%arg0: i32) -> (i32, i32, i32) {
    %c0_i32 = arith.constant 0 : i32
    %c0_i32_0 = arith.constant 0 : i32
    %c0_i32_1 = arith.constant 0 : i32
    return %arg0, %c0_i32, %c0_i32_0 : i32, i32, i32
  }
}

module attributes {stable_mosaic.version = 11 : i64} {
  func.func @kernel(%arg0: i32, %arg1: memref<1x200x512xf32, #tpu.memory_space<vmem>>, %arg2: memref<1x8x200xf32, #tpu.memory_space<vmem>>, %arg3: memref<1x8x512xf32, #tpu.memory_space<vmem>>) attributes {dimension_semantics = [#tpu.dimension_semantics<parallel>], iteration_bounds = array<i64: 1>, scalar_prefetch = 0 : i64, scratch_operands = 0 : i64, tpu.core_type = #tpu.core_type<tc>, window_params = [{transform_indices = @transform_0, window_bounds = array<i64: 1, 200, 512>}, {transform_indices = @transform_1, window_bounds = array<i64: 1, 8, 200>}, {transform_indices = @transform_2, window_bounds = array<i64: 1, 8, 512>}]} {
    %c0 = arith.constant 0 : index
    %c0_0 = arith.constant 0 : index
    %c0_1 = arith.constant 0 : index
    %0 = vector.load %arg2[%c0, %c0_0, %c0_1] : memref<1x8x200xf32, #tpu.memory_space<vmem>>, vector<1x8x200xf32>
    %1 = vector.shape_cast %0 : vector<1x8x200xf32> to vector<8x200xf32>
    %c0_2 = arith.constant 0 : index
    %c0_3 = arith.constant 0 : index
    %c0_4 = arith.constant 0 : index
    %2 = vector.load %arg1[%c0_2, %c0_3, %c0_4] : memref<1x200x512xf32, #tpu.memory_space<vmem>>, vector<1x200x512xf32>
    %3 = vector.shape_cast %2 : vector<1x200x512xf32> to vector<200x512xf32>
    %cst = arith.constant dense<0.000000e+00> : vector<8x512xf32>
    %4 = tpu.matmul %1, %3, %cst {dimension_numbers = #tpu.dot_dimension_numbers<[1], [0], [0], [1], [0, 0, 1, 1], [], []>} : vector<8x200xf32>, vector<200x512xf32>, vector<8x512xf32> -> vector<8x512xf32>
    %cst_5 = arith.constant dense<0.000000e+00> : vector<8xf32>
    %5 = vector.multi_reduction <add>, %4, %cst_5 [1] : vector<8x512xf32> to vector<8xf32>
    %6 = vector.shape_cast %5 : vector<8xf32> to vector<8x1xf32>
    %cst_6 = arith.constant 5.120000e+02 : f32
    %7 = vector.broadcast %cst_6 : f32 to vector<8x1xf32>
    %8 = arith.divf %6, %7 : vector<8x1xf32>
    %9 = vector.broadcast %8 : vector<8x1xf32> to vector<8x512xf32>
    %10 = arith.subf %4, %9 : vector<8x512xf32>
    %11 = arith.mulf %10, %10 : vector<8x512xf32>
    %cst_7 = arith.constant dense<0.000000e+00> : vector<8xf32>
    %12 = vector.multi_reduction <add>, %11, %cst_7 [1] : vector<8x512xf32> to vector<8xf32>
    %13 = vector.shape_cast %12 : vector<8xf32> to vector<8x1xf32>
    %cst_8 = arith.constant 5.120000e+02 : f32
    %14 = vector.broadcast %cst_8 : f32 to vector<8x1xf32>
    %15 = arith.divf %13, %14 : vector<8x1xf32>
    %cst_9 = arith.constant 9.99999974E-6 : f32
    %16 = vector.broadcast %cst_9 : f32 to vector<8x1xf32>
    %17 = arith.addf %15, %16 : vector<8x1xf32>
    %18 = math.rsqrt %17 : vector<8x1xf32>
    %19 = vector.broadcast %18 : vector<8x1xf32> to vector<8x512xf32>
    %20 = arith.mulf %10, %19 : vector<8x512xf32>
    %cst_10 = arith.constant 0.000000e+00 : f32
    %21 = vector.broadcast %cst_10 : f32 to vector<8x512xf32>
    %22 = arith.maximumf %20, %21 : vector<8x512xf32>
    %c0_11 = arith.constant 0 : index
    %c0_12 = arith.constant 0 : index
    %c0_13 = arith.constant 0 : index
    %23 = vector.load %arg3[%c0_11, %c0_12, %c0_13] : memref<1x8x512xf32, #tpu.memory_space<vmem>>, vector<1x8x512xf32>
    %24 = vector.shape_cast %23 : vector<1x8x512xf32> to vector<8x512xf32>
    %25 = vector.shape_cast %22 : vector<8x512xf32> to vector<1x8x512xf32>
    tpu.vector_store %arg3[%c0_11, %c0_12, %c0_13], %25 {strides = array<i32>} : memref<1x8x512xf32, #tpu.memory_space<vmem>>, vector<1x8x512xf32>,
    return
  }
  func.func @transform_0(%arg0: i32) -> (i32, i32, i32) {
    %c0_i32 = arith.constant 0 : i32
    %c0_i32_0 = arith.constant 0 : i32
    %c0_i32_1 = arith.constant 0 : i32
    return %arg0, %c0_i32, %c0_i32_0 : i32, i32, i32
  }
  func.func @transform_1(%arg0: i32) -> (i32, i32, i32) {
    %c0_i32 = arith.constant 0 : i32
    %c0_i32_0 = arith.constant 0 : i32
    %c0_i32_1 = arith.constant 0 : i32
    return %arg0, %c0_i32, %c0_i32_0 : i32, i32, i32
  }
  func.func @transform_2(%arg0: i32) -> (i32, i32, i32) {
    %c0_i32 = arith.constant 0 : i32
    %c0_i32_0 = arith.constant 0 : i32
    %c0_i32_1 = arith.constant 0 : i32
    return %arg0, %c0_i32, %c0_i32_0 : i32, i32, i32
  }
}

module attributes {stable_mosaic.version = 11 : i64} {
  func.func @kernel(%arg0: i32, %arg1: memref<1x216x512xf32, #tpu.memory_space<vmem>>, %arg2: memref<1x4x216xf32, #tpu.memory_space<vmem>>, %arg3: memref<1x4x1xf32, #tpu.memory_space<vmem>>, %arg4: memref<1x4x512xf32, #tpu.memory_space<vmem>>) attributes {dimension_semantics = [#tpu.dimension_semantics<parallel>], iteration_bounds = array<i64: 1>, scalar_prefetch = 0 : i64, scratch_operands = 0 : i64, tpu.core_type = #tpu.core_type<tc>, window_params = [{transform_indices = @transform_0, window_bounds = array<i64: 1, 216, 512>}, {transform_indices = @transform_1, window_bounds = array<i64: 1, 4, 216>}, {transform_indices = @transform_2, window_bounds = array<i64: 1, 4, 1>}, {transform_indices = @transform_3, window_bounds = array<i64: 1, 4, 512>}]} {
    %c0 = arith.constant 0 : index
    %c0_0 = arith.constant 0 : index
    %c0_1 = arith.constant 0 : index
    %0 = vector.load %arg2[%c0, %c0_0, %c0_1] : memref<1x4x216xf32, #tpu.memory_space<vmem>>, vector<1x4x216xf32>
    %1 = vector.shape_cast %0 : vector<1x4x216xf32> to vector<4x216xf32>
    %c0_2 = arith.constant 0 : index
    %c0_3 = arith.constant 0 : index
    %c0_4 = arith.constant 0 : index
    %2 = vector.load %arg1[%c0_2, %c0_3, %c0_4] : memref<1x216x512xf32, #tpu.memory_space<vmem>>, vector<1x216x512xf32>
    %3 = vector.shape_cast %2 : vector<1x216x512xf32> to vector<216x512xf32>
    %cst = arith.constant dense<0.000000e+00> : vector<4x512xf32>
    %4 = tpu.matmul %1, %3, %cst {dimension_numbers = #tpu.dot_dimension_numbers<[1], [0], [0], [1], [0, 0, 1, 1], [], []>} : vector<4x216xf32>, vector<216x512xf32>, vector<4x512xf32> -> vector<4x512xf32>
    %c0_5 = arith.constant 0 : index
    %c0_6 = arith.constant 0 : index
    %c0_7 = arith.constant 0 : index
    %5 = vector.load %arg3[%c0_5, %c0_6, %c0_7] : memref<1x4x1xf32, #tpu.memory_space<vmem>>, vector<1x4x1xf32>
    %6 = vector.shape_cast %5 : vector<1x4x1xf32> to vector<4x1xf32>
    %7 = vector.broadcast %6 : vector<4x1xf32> to vector<4x512xf32>
    %8 = arith.addf %4, %7 : vector<4x512xf32>
    %c0_8 = arith.constant 0 : index
    %c0_9 = arith.constant 0 : index
    %c0_10 = arith.constant 0 : index
    %9 = vector.load %arg4[%c0_8, %c0_9, %c0_10] : memref<1x4x512xf32, #tpu.memory_space<vmem>>, vector<1x4x512xf32>
    %10 = vector.shape_cast %9 : vector<1x4x512xf32> to vector<4x512xf32>
    %11 = vector.shape_cast %8 : vector<4x512xf32> to vector<1x4x512xf32>
    tpu.vector_store %arg4[%c0_8, %c0_9, %c0_10], %11 {strides = array<i32>} : memref<1x4x512xf32, #tpu.memory_space<vmem>>, vector<1x4x512xf32>,
    return
  }
  func.func @transform_0(%arg0: i32) -> (i32, i32, i32) {
    %c0_i32 = arith.constant 0 : i32
    %c0_i32_0 = arith.constant 0 : i32
    %c0_i32_1 = arith.constant 0 : i32
    return %arg0, %c0_i32, %c0_i32_0 : i32, i32, i32
  }
  func.func @transform_1(%arg0: i32) -> (i32, i32, i32) {
    %c0_i32 = arith.constant 0 : i32
    %c0_i32_0 = arith.constant 0 : i32
    %c0_i32_1 = arith.constant 0 : i32
    return %arg0, %c0_i32, %c0_i32_0 : i32, i32, i32
  }
  func.func @transform_2(%arg0: i32) -> (i32, i32, i32) {
    %c0_i32 = arith.constant 0 : i32
    %c0_i32_0 = arith.constant 0 : i32
    %c0_i32_1 = arith.constant 0 : i32
    return %arg0, %c0_i32, %c0_i32_0 : i32, i32, i32
  }
  func.func @transform_3(%arg0: i32) -> (i32, i32, i32) {
    %c0_i32 = arith.constant 0 : i32
    %c0_i32_0 = arith.constant 0 : i32
    %c0_i32_1 = arith.constant 0 : i32
    return %arg0, %c0_i32, %c0_i32_0 : i32, i32, i32
  }
}

</mosaic_0001>

<bundles_post_ra>
// kernel: squeeze.8
= control target key start
LH: loop header
LB: loop body
LE: loop exit
PB: predicated region body
PF: predicated region fallthrough
CT: control target
= control target key end

     0   :  { %vm63_vm0 = vcmask 1047556   ;;  %s289_s14 = smov 112   ;;  %s290_s15 = smov 80   ;;  %vm19_vm1 = vcmask 130048   ;;  %s507_s0 = inlined_call_operand.vmem [shape: f32[1,4,512], index: 0, kind: input, shape index: {}]   ;;  %s508_s1 = inlined_call_operand.vmem [shape: f32[4,2,16,16], index: 1, kind: output, shape index: {}]  }
   0x1   :  { %v235_v0 = vld [vmem:[%s507_s0 + $0xc] sm:$0xf]  ;;  %v236_v1 = vld [vmem:[%s507_s0 + $0x8] sm:$0xf]  ;;  %v237_v2 = vld [vmem:[%s507_s0 + $0x4] sm:$0xf] }
   0x2   :  { %7 = vst [vmem:[#allocation0 + $0x18] sm:$0xf] %v235_v0  ;;  %v16_v3 = vld [vmem:[%s507_s0] sm:$0xf]  ;;  %s288_s0 = smov 96   ;;  %s291_s16 = smov 64  }
   0x3   :  { %11 = vst [vmem:[#allocation0 + $0x10] sm:$0xf] %v236_v1  ;;  %s292_s17 = smov 32   ;;  %s293_s18 = smov 48  }
   0x4   :  { %15 = vst [vmem:[#allocation0 + $0x8] sm:$0xf] %v237_v2  ;;  %s294_s19 = smov 16  }
   0x5   :  { %17 = vst [vmem:[#allocation0] sm:$0xf] %v16_v3 }
   0x9   :  { %v50_v63 = vld [vmem:[#allocation0 + $0x18] sm:$0xf]  }
   0xa   :  { %v39_v60 = vld [vmem:[#allocation0 + $0x10] sm:$0xf]   ;;  %249 = vst.msk [vmem:[%s508_s1 + $0x18] sm:$0x1] %vm19_vm1, %v50_v63  }
   0xb   :  { %v28_v57 = vld [vmem:[#allocation0 + $0x8] sm:$0xf]   ;;  %245 = vst.msk [vmem:[%s508_s1 + $0x10] sm:$0x1] %vm19_vm1, %v39_v60  }
   0xc   :  { %v85_v4 = vld [vmem:[#allocation0] ss:$8 sm:$0xf]   ;;  %v87_v5 = vld [vmem:[#allocation0 - $0x1f] ss:$8 sm:$0xf0]  }
   0xd   :  { %v89_v6 = vsel %vm63_vm0, %v87_v5, %v85_v4  ;;  %v60_v7 = vld [vmem:[#allocation0] ss:$8 sm:$0xf]   ;;  %v62_v8 = vld [vmem:[#allocation0 - $0x1f] ss:$8 sm:$0xf0]  }
   0xe   :  { %90 = vrot.lane.b32.xlu1 %v89_v6, %s288_s0  ;;  %v64_v9 = vsel %vm63_vm0, %v62_v8, %v60_v7  ;;  %v98_v10 = vld [vmem:[#allocation0 + $0x2] ss:$8 sm:$0xf]   ;;  %v100_v11 = vld [vmem:[#allocation0 - $0x1d] ss:$8 sm:$0xf0]  }
   0xf   :  { %65 = vrot.lane.b32.xlu0 %v64_v9, %s289_s14  ;;  %v73_v12 = vld [vmem:[#allocation0 + $0x2] ss:$8 sm:$0xf]   ;;  %v75_v13 = vld [vmem:[#allocation0 - $0x1d] ss:$8 sm:$0xf0]   ;;  %v102_v14 = vsel %vm63_vm0, %v100_v11, %v98_v10 }
  0x10   :  { %v77_v15 = vsel %vm63_vm0, %v75_v13, %v73_v12  ;;  %v110_v16 = vld [vmem:[#allocation0] ss:$8 sm:$0xf]   ;;  %v112_v17 = vld [vmem:[#allocation0 - $0x1f] ss:$8 sm:$0xf0]  }
  0x11   :  { %v114_v18 = vsel %vm63_vm0, %v112_v17, %v110_v16  ;;  %v148_v19 = vld [vmem:[#allocation0 + $0x2] ss:$8 sm:$0xf]   ;;  %v150_v20 = vld [vmem:[#allocation0 - $0x1d] ss:$8 sm:$0xf0]  }
  0x12   :  { %115 = vrot.lane.b32.xlu2 %v114_v18, %s290_s15  ;;  %v123_v21 = vld [vmem:[#allocation0 + $0x2] ss:$8 sm:$0xf]   ;;  %v125_v22 = vld [vmem:[#allocation0 - $0x1d] ss:$8 sm:$0xf0]   ;;  %v152_v25 = vsel %vm63_vm0, %v150_v20, %v148_v19 }
  0x13   :  { %v135_v23 = vld [vmem:[#allocation0] ss:$8 sm:$0xf]   ;;  %v137_v24 = vld [vmem:[#allocation0 - $0x1f] ss:$8 sm:$0xf0]   ;;  %v127_v26 = vsel %vm63_vm0, %v125_v22, %v123_v21 }
  0x14   :  { %v139_v27 = vsel %vm63_vm0, %v137_v24, %v135_v23  ;;  %v185_v28 = vld [vmem:[#allocation0] ss:$8 sm:$0xf]   ;;  %v187_v29 = vld [vmem:[#allocation0 - $0x1f] ss:$8 sm:$0xf0]  }
  0x15   :  { %v160_v30 = vld [vmem:[#allocation0] ss:$8 sm:$0xf]   ;;  %v162_v31 = vld [vmem:[#allocation0 - $0x1f] ss:$8 sm:$0xf0]   ;;  %v189_v34 = vsel %vm63_vm0, %v187_v29, %v185_v28 }
  0x16   :  { %103 = vrot.lane.b32.xlu1 %v102_v14, %s288_s0  ;;  %v173_v32 = vld [vmem:[#allocation0 + $0x2] ss:$8 sm:$0xf]   ;;  %v175_v33 = vld [vmem:[#allocation0 - $0x1d] ss:$8 sm:$0xf0]   ;;  %v164_v35 = vsel %vm63_vm0, %v162_v31, %v160_v30 }
  0x17   :  { %78 = vrot.lane.b32.xlu0 %v77_v15, %s289_s14  ;;  %v177_v36 = vsel %vm63_vm0, %v175_v33, %v173_v32  ;;  %v223_v37 = vld [vmem:[#allocation0 + $0x2] ss:$8 sm:$0xf]   ;;  %v225_v38 = vld [vmem:[#allocation0 - $0x1d] ss:$8 sm:$0xf0]  }
  0x18   :  { %v198_v39 = vld [vmem:[#allocation0 + $0x2] ss:$8 sm:$0xf]   ;;  %v200_v40 = vld [vmem:[#allocation0 - $0x1d] ss:$8 sm:$0xf0]   ;;  %v227_v43 = vsel %vm63_vm0, %v225_v38, %v223_v37 }
  0x19   :  { %v210_v41 = vld [vmem:[#allocation0] ss:$8 sm:$0xf]   ;;  %v212_v42 = vld [vmem:[#allocation0 - $0x1f] ss:$8 sm:$0xf0]   ;;  %v202_v44 = vsel %vm63_vm0, %v200_v40, %v198_v39 }
  0x1a   :  { %128 = vrot.lane.b32.xlu2 %v127_v26, %s290_s15  ;;  %v214_v45 = vsel %vm63_vm0, %v212_v42, %v210_v41  ;;  %v18_v51 = vld [vmem:[#allocation0] sm:$0xf]   ;;  %241 = vst.msk [vmem:[%s508_s1 + $0x8] sm:$0x1] %vm19_vm1, %v28_v57  }
  0x1b   :  { %20 = vst.msk [vmem:[%s508_s1] sm:$0x1] %vm19_vm1, %v18_v51  }
  0x1c   :  { %238 = vst.msk [vmem:[%s508_s1 + $0x1f] sm:$0x2] %vm19_vm1, %v18_v51  }
  0x1d   :  { %239 = vst.msk [vmem:[%s508_s1 + $0x3e] sm:$0x4] %vm19_vm1, %v18_v51  }
  0x1e   :  { %153 = vrot.lane.b32.xlu1 %v152_v25, %s291_s16  ;;  %240 = vst.msk [vmem:[%s508_s1 + $0x5d] sm:$0x8] %vm19_vm1, %v18_v51  }
  0x1f   :  { %140 = vrot.lane.b32.xlu0 %v139_v27, %s291_s16  ;;  %242 = vst.msk [vmem:[%s508_s1 + $0x27] sm:$0x2] %vm19_vm1, %v28_v57  }
  0x20   :  { %243 = vst.msk [vmem:[%s508_s1 + $0x46] sm:$0x4] %vm19_vm1, %v28_v57  }
  0x21   :  { %244 = vst.msk [vmem:[%s508_s1 + $0x65] sm:$0x8] %vm19_vm1, %v28_v57  }
  0x22   :  { %165 = vrot.lane.b32.xlu2 %v164_v35, %s293_s18  ;;  %246 = vst.msk [vmem:[%s508_s1 + $0x2f] sm:$0x2] %vm19_vm1, %v39_v60  }
  0x23   :  { %247 = vst.msk [vmem:[%s508_s1 + $0x4e] sm:$0x4] %vm19_vm1, %v39_v60  }
  0x24   :  { %248 = vst.msk [vmem:[%s508_s1 + $0x6d] sm:$0x8] %vm19_vm1, %v39_v60  }
  0x25   :  { %250 = vst.msk [vmem:[%s508_s1 + $0x37] sm:$0x2] %vm19_vm1, %v50_v63  }
  0x26   :  { %190 = vrot.lane.b32.xlu1 %v189_v34, %s292_s17  ;;  %251 = vst.msk [vmem:[%s508_s1 + $0x56] sm:$0x4] %vm19_vm1, %v50_v63  }
  0x27   :  { %178 = vrot.lane.b32.xlu0 %v177_v36, %s293_s18  ;;  %252 = vst.msk [vmem:[%s508_s1 + $0x75] sm:$0x8] %vm19_vm1, %v50_v63  }
  0x2a   :  { %203 = vrot.lane.b32.xlu2 %v202_v44, %s292_s17 }
  0x2e   :  { %228 = vrot.lane.b32.xlu1 %v227_v43, %s294_s19 }
  0x2f   :  { %215 = vrot.lane.b32.xlu0 %v214_v45, %s294_s19 }
  0x6c   :  { %v116_v46 = vpop.permute.xlu2 %115  }
  0x6d   :  { %261 = vst.msk [vmem:[%s508_s1 + $0x3] ss:$8 sm:$0xf] %vm19_vm1, %v116_v46  }
  0x6e   :  { %262 = vst.msk [vmem:[%s508_s1 + $0x3] ss:$8 sm:$0xf0] %vm19_vm1, %v116_v46  }
  0x74   :  { %v129_v47 = vpop.permute.xlu2 %128  }
  0x75   :  { %263 = vst.msk [vmem:[%s508_s1 + $0x43] ss:$8 sm:$0xf] %vm19_vm1, %v129_v47  }
  0x76   :  { %264 = vst.msk [vmem:[%s508_s1 + $0x43] ss:$8 sm:$0xf0] %vm19_vm1, %v129_v47  }
  0x7c   :  { %v166_v49 = vpop.permute.xlu2 %165  }
  0x7d   :  { %269 = vst.msk [vmem:[%s508_s1 + $0x5] ss:$8 sm:$0xf] %vm19_vm1, %v166_v49  }
  0x7e   :  { %270 = vst.msk [vmem:[%s508_s1 + $0x5] ss:$8 sm:$0xf0] %vm19_vm1, %v166_v49  }
  0x80   :  { %v91_v48 = vpop.permute.xlu1 %90  }
  0x81   :  { %257 = vst.msk [vmem:[%s508_s1 + $0x2] ss:$8 sm:$0xf] %vm19_vm1, %v91_v48   ;;  %v66_v50 = vpop.permute.xlu0 %65  }
  0x82   :  { %258 = vst.msk [vmem:[%s508_s1 + $0x2] ss:$8 sm:$0xf0] %vm19_vm1, %v91_v48  }
  0x83   :  { %253 = vst.msk [vmem:[%s508_s1 + $0x1] ss:$8 sm:$0xf] %vm19_vm1, %v66_v50  }
  0x84   :  { %254 = vst.msk [vmem:[%s508_s1 + $0x1] ss:$8 sm:$0xf0] %vm19_vm1, %v66_v50   ;;  %v204_v53 = vpop.permute.xlu2 %203  }
  0x85   :  { %275 = vst.msk [vmem:[%s508_s1 + $0x46] ss:$8 sm:$0xf] %vm19_vm1, %v204_v53  }
  0x86   :  { %276 = vst.msk [vmem:[%s508_s1 + $0x46] ss:$8 sm:$0xf0] %vm19_vm1, %v204_v53  }
  0x88   :  { %v104_v52 = vpop.permute.xlu1 %103  }
  0x89   :  { %259 = vst.msk [vmem:[%s508_s1 + $0x42] ss:$8 sm:$0xf] %vm19_vm1, %v104_v52   ;;  %v79_v54 = vpop.permute.xlu0 %78  }
  0x8a   :  { %260 = vst.msk [vmem:[%s508_s1 + $0x42] ss:$8 sm:$0xf0] %vm19_vm1, %v104_v52  }
  0x8b   :  { %255 = vst.msk [vmem:[%s508_s1 + $0x41] ss:$8 sm:$0xf] %vm19_vm1, %v79_v54  }
  0x8c   :  { %256 = vst.msk [vmem:[%s508_s1 + $0x41] ss:$8 sm:$0xf0] %vm19_vm1, %v79_v54  }
  0x90   :  { %v154_v55 = vpop.permute.xlu1 %153  }
  0x91   :  { %267 = vst.msk [vmem:[%s508_s1 + $0x44] ss:$8 sm:$0xf] %vm19_vm1, %v154_v55   ;;  %v141_v56 = vpop.permute.xlu0 %140  }
  0x92   :  { %268 = vst.msk [vmem:[%s508_s1 + $0x44] ss:$8 sm:$0xf0] %vm19_vm1, %v154_v55  }
  0x93   :  { %265 = vst.msk [vmem:[%s508_s1 + $0x4] ss:$8 sm:$0xf] %vm19_vm1, %v141_v56  }
  0x94   :  { %266 = vst.msk [vmem:[%s508_s1 + $0x4] ss:$8 sm:$0xf0] %vm19_vm1, %v141_v56  }
  0x98   :  { %v191_v58 = vpop.permute.xlu1 %190  }
  0x99   :  { %273 = vst.msk [vmem:[%s508_s1 + $0x6] ss:$8 sm:$0xf] %vm19_vm1, %v191_v58   ;;  %v179_v59 = vpop.permute.xlu0 %178  }
  0x9a   :  { %274 = vst.msk [vmem:[%s508_s1 + $0x6] ss:$8 sm:$0xf0] %vm19_vm1, %v191_v58  }
  0x9b   :  { %271 = vst.msk [vmem:[%s508_s1 + $0x45] ss:$8 sm:$0xf] %vm19_vm1, %v179_v59  }
  0x9c   :  { %272 = vst.msk [vmem:[%s508_s1 + $0x45] ss:$8 sm:$0xf0] %vm19_vm1, %v179_v59  }
  0xa0   :  { %v229_v61 = vpop.permute.xlu1 %228  }
  0xa1   :  { %279 = vst.msk [vmem:[%s508_s1 + $0x47] ss:$8 sm:$0xf] %vm19_vm1, %v229_v61   ;;  %v216_v62 = vpop.permute.xlu0 %215  }
  0xa2   :  { %280 = vst.msk [vmem:[%s508_s1 + $0x47] ss:$8 sm:$0xf0] %vm19_vm1, %v229_v61  }
  0xa3   :  { %277 = vst.msk [vmem:[%s508_s1 + $0x7] ss:$8 sm:$0xf] %vm19_vm1, %v216_v62  }
  0xa4   :  { %278 = vst.msk [vmem:[%s508_s1 + $0x7] ss:$8 sm:$0xf0] %vm19_vm1, %v216_v62  }

// kernel: squeeze.9
= control target key start
LH: loop header
LB: loop body
LE: loop exit
PB: predicated region body
PF: predicated region fallthrough
CT: control target
= control target key end

     0   :  { %vm79_vm0 = vcmask 1047556   ;;  %s579_s14 = smov 112   ;;  %s580_s27 = smov 96   ;;  %vm3_vm1 = vcmask 130048   ;;  %s1156_s0 = inlined_call_operand.vmem [shape: f32[1,8,512], index: 0, kind: input, shape index: {}]   ;;  %s1157_s1 = inlined_call_operand.vmem [shape: f32[8,2,16,16], index: 1, kind: output, shape index: {}]  }
   0x1   :  { %v76_v0 = vld [vmem:[%s1156_s0] ss:$8 sm:$0xf]   ;;  %v467_v1 = vld [vmem:[%s1156_s0 - $0x1f] ss:$8 sm:$0xf0]  }
   0x2   :  { %v80_v2 = vsel %vm79_vm0, %v467_v1, %v76_v0  ;;  %v474_v3 = vld [vmem:[%s1156_s0 + $0x4] ss:$8 sm:$0xf]   ;;  %v475_v4 = vld [vmem:[%s1156_s0 - $0x1b] ss:$8 sm:$0xf0]  }
   0x3   :  { %81 = vrot.lane.b32.xlu0 %v80_v2, %s579_s14  ;;  %v106_v5 = vsel %vm79_vm0, %v475_v4, %v474_v3  ;;  %v470_v6 = vld [vmem:[%s1156_s0 + $0x2] ss:$8 sm:$0xf]   ;;  %v471_v7 = vld [vmem:[%s1156_s0 - $0x1d] ss:$8 sm:$0xf0]  }
   0x4   :  { %107 = vrot.lane.b32.xlu1 %v106_v5, %s579_s14  ;;  %v478_v8 = vld [vmem:[%s1156_s0 + $0x6] ss:$8 sm:$0xf]   ;;  %v479_v9 = vld [vmem:[%s1156_s0 - $0x19] ss:$8 sm:$0xf0]   ;;  %v93_v10 = vsel %vm79_vm0, %v471_v7, %v470_v6 }
   0x5   :  { %v127_v11 = vld [vmem:[%s1156_s0] ss:$8 sm:$0xf]   ;;  %v119_v12 = vsel %vm79_vm0, %v479_v9, %v478_v8  ;;  %v482_v13 = vld [vmem:[%s1156_s0 - $0x1f] ss:$8 sm:$0xf0]  }
   0x6   :  { %v131_v14 = vsel %vm79_vm0, %v482_v13, %v127_v11  ;;  %v489_v15 = vld [vmem:[%s1156_s0 + $0x4] ss:$8 sm:$0xf]   ;;  %v490_v16 = vld [vmem:[%s1156_s0 - $0x1b] ss:$8 sm:$0xf0]  }
   0x7   :  { %132 = vrot.lane.b32.xlu2 %v131_v14, %s580_s27  ;;  %v485_v17 = vld [vmem:[%s1156_s0 + $0x2] ss:$8 sm:$0xf]   ;;  %v486_v18 = vld [vmem:[%s1156_s0 - $0x1d] ss:$8 sm:$0xf0]   ;;  %v157_v21 = vsel %vm79_vm0, %v490_v16, %v489_v15 }
   0x8   :  { %v493_v19 = vld [vmem:[%s1156_s0 + $0x6] ss:$8 sm:$0xf]   ;;  %v494_v20 = vld [vmem:[%s1156_s0 - $0x19] ss:$8 sm:$0xf0]   ;;  %v144_v22 = vsel %vm79_vm0, %v486_v18, %v485_v17 }
   0x9   :  { %v170_v23 = vsel %vm79_vm0, %v494_v20, %v493_v19  ;;  %v500_v24 = vld [vmem:[%s1156_s0 + $0x2] ss:$8 sm:$0xf]   ;;  %v501_v25 = vld [vmem:[%s1156_s0 - $0x1d] ss:$8 sm:$0xf0]  }
   0xa   :  { %v178_v26 = vld [vmem:[%s1156_s0] ss:$8 sm:$0xf]   ;;  %v497_v27 = vld [vmem:[%s1156_s0 - $0x1f] ss:$8 sm:$0xf0]   ;;  %v195_v30 = vsel %vm79_vm0, %v501_v25, %v500_v24 }
   0xb   :  { %94 = vrot.lane.b32.xlu0 %v93_v10, %s579_s14  ;;  %v504_v28 = vld [vmem:[%s1156_s0 + $0x4] ss:$8 sm:$0xf]   ;;  %v505_v29 = vld [vmem:[%s1156_s0 - $0x1b] ss:$8 sm:$0xf0]   ;;  %v182_v31 = vsel %vm79_vm0, %v497_v27, %v178_v26 }
   0xc   :  { %120 = vrot.lane.b32.xlu1 %v119_v12, %s579_s14  ;;  %v208_v32 = vsel %vm79_vm0, %v505_v29, %v504_v28  ;;  %s581_s23 = smov 80   ;;  %v229_v33 = vld [vmem:[%s1156_s0] ss:$8 sm:$0xf]   ;;  %s582_s11 = smov 64  }
   0xd   :  { %v512_v34 = vld [vmem:[%s1156_s0 - $0x1f] ss:$8 sm:$0xf0]   ;;  %v508_v35 = vld [vmem:[%s1156_s0 + $0x6] ss:$8 sm:$0xf]  }
   0xe   :  { %v509_v36 = vld [vmem:[%s1156_s0 - $0x19] ss:$8 sm:$0xf0]   ;;  %v382_v37 = vld [vmem:[%s1156_s0] ss:$8 sm:$0xf]   ;;  %v233_v42 = vsel %vm79_vm0, %v512_v34, %v229_v33 }
   0xf   :  { %145 = vrot.lane.b32.xlu2 %v144_v22, %s580_s27  ;;  %v557_v38 = vld [vmem:[%s1156_s0 - $0x1f] ss:$8 sm:$0xf0]   ;;  %v515_v39 = vld [vmem:[%s1156_s0 + $0x2] ss:$8 sm:$0xf]   ;;  %v221_v43 = vsel %vm79_vm0, %v509_v36, %v508_v35 }
  0x10   :  { %v516_v40 = vld [vmem:[%s1156_s0 - $0x1d] ss:$8 sm:$0xf0]   ;;  %v386_v41 = vsel %vm79_vm0, %v557_v38, %v382_v37  ;;  %v523_v45 = vld [vmem:[%s1156_s0 + $0x6] ss:$8 sm:$0xf]  }
  0x11   :  { %v246_v44 = vsel %vm79_vm0, %v516_v40, %v515_v39  ;;  %v524_v46 = vld [vmem:[%s1156_s0 - $0x19] ss:$8 sm:$0xf0]   ;;  %v519_v47 = vld [vmem:[%s1156_s0 + $0x4] ss:$8 sm:$0xf]  }
  0x12   :  { %v520_v48 = vld [vmem:[%s1156_s0 - $0x1b] ss:$8 sm:$0xf0]   ;;  %v560_v49 = vld [vmem:[%s1156_s0 + $0x2] ss:$8 sm:$0xf]   ;;  %v272_v57 = vsel %vm79_vm0, %v524_v46, %v523_v45 }
  0x13   :  { %158 = vrot.lane.b32.xlu0 %v157_v21, %s580_s27  ;;  %v561_v50 = vld [vmem:[%s1156_s0 - $0x1d] ss:$8 sm:$0xf0]   ;;  %v568_v52 = vld [vmem:[%s1156_s0 + $0x6] ss:$8 sm:$0xf]   ;;  %v259_v58 = vsel %vm79_vm0, %v520_v48, %v519_v47 }
  0x14   :  { %171 = vrot.lane.b32.xlu1 %v170_v23, %s580_s27  ;;  %v399_v51 = vsel %vm79_vm0, %v561_v50, %v560_v49  ;;  %v569_v53 = vld [vmem:[%s1156_s0 - $0x19] ss:$8 sm:$0xf0]   ;;  %v280_v54 = vld [vmem:[%s1156_s0] ss:$8 sm:$0xf]  }
  0x15   :  { %v527_v55 = vld [vmem:[%s1156_s0 - $0x1f] ss:$8 sm:$0xf0]   ;;  %v425_v56 = vsel %vm79_vm0, %v569_v53, %v568_v52  ;;  %v534_v60 = vld [vmem:[%s1156_s0 + $0x4] ss:$8 sm:$0xf]  }
  0x16   :  { %v284_v59 = vsel %vm79_vm0, %v527_v55, %v280_v54  ;;  %v535_v61 = vld [vmem:[%s1156_s0 - $0x1b] ss:$8 sm:$0xf0]   ;;  %v530_v62 = vld [vmem:[%s1156_s0 + $0x2] ss:$8 sm:$0xf]  }
  0x17   :  { %183 = vrot.lane.b32.xlu2 %v182_v31, %s581_s23  ;;  %v531_v63 = vld [vmem:[%s1156_s0 - $0x1d] ss:$8 sm:$0xf0]   ;;  %v553_v0 = vld [vmem:[%s1156_s0 + $0x6] ss:$8 sm:$0xf]   ;;  %v310_v8 = vsel %vm79_vm0, %v535_v61, %v534_v60 }
  0x18   :  { %v554_v1 = vld [vmem:[%s1156_s0 - $0x19] ss:$8 sm:$0xf0]   ;;  %v564_v3 = vld [vmem:[%s1156_s0 + $0x4] ss:$8 sm:$0xf]   ;;  %v297_v9 = vsel %vm79_vm0, %v531_v63, %v530_v62 }
  0x19   :  { %v374_v2 = vsel %vm79_vm0, %v554_v1, %v553_v0  ;;  %v565_v4 = vld [vmem:[%s1156_s0 - $0x1b] ss:$8 sm:$0xf0]   ;;  %v538_v5 = vld [vmem:[%s1156_s0 + $0x6] ss:$8 sm:$0xf]  }
  0x1a   :  { %v539_v6 = vld [vmem:[%s1156_s0 - $0x19] ss:$8 sm:$0xf0]   ;;  %v412_v7 = vsel %vm79_vm0, %v565_v4, %v564_v3  ;;  %v545_v11 = vld [vmem:[%s1156_s0 + $0x2] ss:$8 sm:$0xf]  }
  0x1b   :  { %196 = vrot.lane.b32.xlu0 %v195_v30, %s581_s23  ;;  %v323_v10 = vsel %vm79_vm0, %v539_v6, %v538_v5  ;;  %v546_v12 = vld [vmem:[%s1156_s0 - $0x1d] ss:$8 sm:$0xf0]   ;;  %v331_v13 = vld [vmem:[%s1156_s0] ss:$8 sm:$0xf]  }
  0x1c   :  { %209 = vrot.lane.b32.xlu1 %v208_v32, %s581_s23  ;;  %v542_v14 = vld [vmem:[%s1156_s0 - $0x1f] ss:$8 sm:$0xf0]   ;;  %v549_v15 = vld [vmem:[%s1156_s0 + $0x4] ss:$8 sm:$0xf]   ;;  %v348_v17 = vsel %vm79_vm0, %v546_v12, %v545_v11 }
  0x1d   :  { %v550_v16 = vld [vmem:[%s1156_s0 - $0x1b] ss:$8 sm:$0xf0]   ;;  %v335_v18 = vsel %vm79_vm0, %v542_v14, %v331_v13  ;;  %s584_s7 = smov 32   ;;  %s585_s8 = smov 16  }
  0x1e   :  { %v361_v19 = vsel %vm79_vm0, %v550_v16, %v549_v15  ;;  %v2_v40 = vld [vmem:[%s1156_s0] sm:$0xff]   ;;  %v440_v48 = vld [vmem:[%s1156_s0 + $0x8] sm:$0xff]   ;;  %v449_v50 = vld [vmem:[%s1156_s0 + $0x10] sm:$0xff]  }
  0x1f   :  { %222 = vrot.lane.b32.xlu2 %v221_v43, %s581_s23  ;;  %4 = vst.msk [vmem:[%s1157_s1] sm:$0x1] %vm3_vm1, %v2_v40  }
  0x20   :  { %433 = vst.msk [vmem:[%s1157_s1 + $0x1f] sm:$0x2] %vm3_vm1, %v2_v40  }
  0x21   :  { %434 = vst.msk [vmem:[%s1157_s1 + $0x3e] sm:$0x4] %vm3_vm1, %v2_v40  }
  0x22   :  { %435 = vst.msk [vmem:[%s1157_s1 + $0x5d] sm:$0x8] %vm3_vm1, %v2_v40  }
  0x23   :  { %234 = vrot.lane.b32.xlu0 %v233_v42, %s582_s11  ;;  %436 = vst.msk [vmem:[%s1157_s1 + $0x7c] sm:$0x10] %vm3_vm1, %v2_v40  }
  0x24   :  { %247 = vrot.lane.b32.xlu1 %v246_v44, %s582_s11  ;;  %437 = vst.msk [vmem:[%s1157_s1 + $0x9b] sm:$0x20] %vm3_vm1, %v2_v40  }
  0x25   :  { %438 = vst.msk [vmem:[%s1157_s1 + $0xba] sm:$0x40] %vm3_vm1, %v2_v40  }
  0x26   :  { %439 = vst.msk [vmem:[%s1157_s1 + $0xd9] sm:$0x80] %vm3_vm1, %v2_v40  }
  0x27   :  { %260 = vrot.lane.b32.xlu2 %v259_v58, %s582_s11  ;;  %441 = vst.msk [vmem:[%s1157_s1 + $0x8] sm:$0x1] %vm3_vm1, %v440_v48  }
  0x28   :  { %442 = vst.msk [vmem:[%s1157_s1 + $0x27] sm:$0x2] %vm3_vm1, %v440_v48  }
  0x29   :  { %443 = vst.msk [vmem:[%s1157_s1 + $0x46] sm:$0x4] %vm3_vm1, %v440_v48  }
  0x2a   :  { %444 = vst.msk [vmem:[%s1157_s1 + $0x65] sm:$0x8] %vm3_vm1, %v440_v48  }
  0x2b   :  { %273 = vrot.lane.b32.xlu0 %v272_v57, %s582_s11  ;;  %s583_s11 = smov 48   ;;  %445 = vst.msk [vmem:[%s1157_s1 + $0x84] sm:$0x10] %vm3_vm1, %v440_v48  }
  0x2c   :  { %285 = vrot.lane.b32.xlu1 %v284_v59, %s583_s11  ;;  %446 = vst.msk [vmem:[%s1157_s1 + $0xa3] sm:$0x20] %vm3_vm1, %v440_v48  }
  0x2d   :  { %447 = vst.msk [vmem:[%s1157_s1 + $0xc2] sm:$0x40] %vm3_vm1, %v440_v48  }
  0x2e   :  { %448 = vst.msk [vmem:[%s1157_s1 + $0xe1] sm:$0x80] %vm3_vm1, %v440_v48  }
  0x2f   :  { %298 = vrot.lane.b32.xlu2 %v297_v9, %s583_s11  ;;  %450 = vst.msk [vmem:[%s1157_s1 + $0x10] sm:$0x1] %vm3_vm1, %v449_v50  }
  0x30   :  { %451 = vst.msk [vmem:[%s1157_s1 + $0x2f] sm:$0x2] %vm3_vm1, %v449_v50  }
  0x31   :  { %452 = vst.msk [vmem:[%s1157_s1 + $0x4e] sm:$0x4] %vm3_vm1, %v449_v50  }
  0x32   :  { %453 = vst.msk [vmem:[%s1157_s1 + $0x6d] sm:$0x8] %vm3_vm1, %v449_v50  }
  0x33   :  { %311 = vrot.lane.b32.xlu0 %v310_v8, %s583_s11  ;;  %454 = vst.msk [vmem:[%s1157_s1 + $0x8c] sm:$0x10] %vm3_vm1, %v449_v50  }
  0x34   :  { %324 = vrot.lane.b32.xlu1 %v323_v10, %s583_s11  ;;  %455 = vst.msk [vmem:[%s1157_s1 + $0xab] sm:$0x20] %vm3_vm1, %v449_v50  }
  0x35   :  { %456 = vst.msk [vmem:[%s1157_s1 + $0xca] sm:$0x40] %vm3_vm1, %v449_v50  }
  0x36   :  { %457 = vst.msk [vmem:[%s1157_s1 + $0xe9] sm:$0x80] %vm3_vm1, %v449_v50  }
  0x37   :  { %336 = vrot.lane.b32.xlu2 %v335_v18, %s584_s7 }
  0x3b   :  { %349 = vrot.lane.b32.xlu0 %v348_v17, %s584_s7 }
  0x3c   :  { %362 = vrot.lane.b32.xlu1 %v361_v19, %s584_s7 }
  0x3f   :  { %375 = vrot.lane.b32.xlu2 %v374_v2, %s584_s7 }
  0x43   :  { %387 = vrot.lane.b32.xlu0 %v386_v41, %s585_s8 }
  0x44   :  { %400 = vrot.lane.b32.xlu1 %v399_v51, %s585_s8  ;;  %v458_v51 = vld [vmem:[%s1156_s0 + $0x18] sm:$0xff]  }
  0x45   :  { %459 = vst.msk [vmem:[%s1157_s1 + $0x18] sm:$0x1] %vm3_vm1, %v458_v51  }
  0x46   :  { %460 = vst.msk [vmem:[%s1157_s1 + $0x37] sm:$0x2] %vm3_vm1, %v458_v51  }
  0x47   :  { %413 = vrot.lane.b32.xlu2 %v412_v7, %s585_s8  ;;  %461 = vst.msk [vmem:[%s1157_s1 + $0x56] sm:$0x4] %vm3_vm1, %v458_v51  }
  0x48   :  { %462 = vst.msk [vmem:[%s1157_s1 + $0x75] sm:$0x8] %vm3_vm1, %v458_v51  }
  0x49   :  { %463 = vst.msk [vmem:[%s1157_s1 + $0x94] sm:$0x10] %vm3_vm1, %v458_v51  }
  0x4a   :  { %464 = vst.msk [vmem:[%s1157_s1 + $0xb3] sm:$0x20] %vm3_vm1, %v458_v51  }
  0x4b   :  { %426 = vrot.lane.b32.xlu0 %v425_v56, %s585_s8  ;;  %465 = vst.msk [vmem:[%s1157_s1 + $0xd2] sm:$0x40] %vm3_vm1, %v458_v51  }
  0x4c   :  { %466 = vst.msk [vmem:[%s1157_s1 + $0xf1] sm:$0x80] %vm3_vm1, %v458_v51  }
  0x61   :  { %v133_v20 = vpop.permute.xlu2 %132  }
  0x62   :  { %483 = vst.msk [vmem:[%s1157_s1 + $0x2] ss:$8 sm:$0xf] %vm3_vm1, %v133_v20  }
  0x63   :  { %484 = vst.msk [vmem:[%s1157_s1 + $0x2] ss:$8 sm:$0xf0] %vm3_vm1, %v133_v20  }
  0x69   :  { %v146_v21 = vpop.permute.xlu2 %145  }
  0x6a   :  { %487 = vst.msk [vmem:[%s1157_s1 + $0x42] ss:$8 sm:$0xf] %vm3_vm1, %v146_v21  }
  0x6b   :  { %488 = vst.msk [vmem:[%s1157_s1 + $0x42] ss:$8 sm:$0xf0] %vm3_vm1, %v146_v21  }
  0x71   :  { %v184_v23 = vpop.permute.xlu2 %183  }
  0x72   :  { %498 = vst.msk [vmem:[%s1157_s1 + $0x3] ss:$8 sm:$0xf] %vm3_vm1, %v184_v23  }
  0x73   :  { %499 = vst.msk [vmem:[%s1157_s1 + $0x3] ss:$8 sm:$0xf0] %vm3_vm1, %v184_v23  }
  0x75   :  { %v82_v22 = vpop.permute.xlu0 %81  }
  0x76   :  { %468 = vst.msk [vmem:[%s1157_s1 + $0x1] ss:$8 sm:$0xf] %vm3_vm1, %v82_v22   ;;  %v108_v24 = vpop.permute.xlu1 %107  }
  0x77   :  { %469 = vst.msk [vmem:[%s1157_s1 + $0x1] ss:$8 sm:$0xf0] %vm3_vm1, %v82_v22  }
  0x78   :  { %476 = vst.msk [vmem:[%s1157_s1 + $0x81] ss:$8 sm:$0xf] %vm3_vm1, %v108_v24  }
  0x79   :  { %477 = vst.msk [vmem:[%s1157_s1 + $0x81] ss:$8 sm:$0xf0] %vm3_vm1, %v108_v24   ;;  %v223_v26 = vpop.permute.xlu2 %222  }
  0x7a   :  { %510 = vst.msk [vmem:[%s1157_s1 + $0xc3] ss:$8 sm:$0xf] %vm3_vm1, %v223_v26  }
  0x7b   :  { %511 = vst.msk [vmem:[%s1157_s1 + $0xc3] ss:$8 sm:$0xf0] %vm3_vm1, %v223_v26  }
  0x7d   :  { %v95_v25 = vpop.permute.xlu0 %94  }
  0x7e   :  { %472 = vst.msk [vmem:[%s1157_s1 + $0x41] ss:$8 sm:$0xf] %vm3_vm1, %v95_v25   ;;  %v121_v27 = vpop.permute.xlu1 %120  }
  0x7f   :  { %473 = vst.msk [vmem:[%s1157_s1 + $0x41] ss:$8 sm:$0xf0] %vm3_vm1, %v95_v25  }
  0x80   :  { %480 = vst.msk [vmem:[%s1157_s1 + $0xc1] ss:$8 sm:$0xf] %vm3_vm1, %v121_v27  }
  0x81   :  { %481 = vst.msk [vmem:[%s1157_s1 + $0xc1] ss:$8 sm:$0xf0] %vm3_vm1, %v121_v27   ;;  %v261_v29 = vpop.permute.xlu2 %260  }
  0x82   :  { %521 = vst.msk [vmem:[%s1157_s1 + $0x84] ss:$8 sm:$0xf] %vm3_vm1, %v261_v29  }
  0x83   :  { %522 = vst.msk [vmem:[%s1157_s1 + $0x84] ss:$8 sm:$0xf0] %vm3_vm1, %v261_v29  }
  0x85   :  { %v159_v28 = vpop.permute.xlu0 %158  }
  0x86   :  { %491 = vst.msk [vmem:[%s1157_s1 + $0x82] ss:$8 sm:$0xf] %vm3_vm1, %v159_v28   ;;  %v172_v30 = vpop.permute.xlu1 %171  }
  0x87   :  { %492 = vst.msk [vmem:[%s1157_s1 + $0x82] ss:$8 sm:$0xf0] %vm3_vm1, %v159_v28  }
  0x88   :  { %495 = vst.msk [vmem:[%s1157_s1 + $0xc2] ss:$8 sm:$0xf] %vm3_vm1, %v172_v30  }
  0x89   :  { %496 = vst.msk [vmem:[%s1157_s1 + $0xc2] ss:$8 sm:$0xf0] %vm3_vm1, %v172_v30   ;;  %v299_v32 = vpop.permute.xlu2 %298  }
  0x8a   :  { %532 = vst.msk [vmem:[%s1157_s1 + $0x45] ss:$8 sm:$0xf] %vm3_vm1, %v299_v32  }
  0x8b   :  { %533 = vst.msk [vmem:[%s1157_s1 + $0x45] ss:$8 sm:$0xf0] %vm3_vm1, %v299_v32  }
  0x8d   :  { %v197_v31 = vpop.permute.xlu0 %196  }
  0x8e   :  { %502 = vst.msk [vmem:[%s1157_s1 + $0x43] ss:$8 sm:$0xf] %vm3_vm1, %v197_v31   ;;  %v210_v33 = vpop.permute.xlu1 %209  }
  0x8f   :  { %503 = vst.msk [vmem:[%s1157_s1 + $0x43] ss:$8 sm:$0xf0] %vm3_vm1, %v197_v31  }
  0x90   :  { %506 = vst.msk [vmem:[%s1157_s1 + $0x83] ss:$8 sm:$0xf] %vm3_vm1, %v210_v33  }
  0x91   :  { %507 = vst.msk [vmem:[%s1157_s1 + $0x83] ss:$8 sm:$0xf0] %vm3_vm1, %v210_v33   ;;  %v337_v35 = vpop.permute.xlu2 %336  }
  0x92   :  { %543 = vst.msk [vmem:[%s1157_s1 + $0x6] ss:$8 sm:$0xf] %vm3_vm1, %v337_v35  }
  0x93   :  { %544 = vst.msk [vmem:[%s1157_s1 + $0x6] ss:$8 sm:$0xf0] %vm3_vm1, %v337_v35  }
  0x95   :  { %v235_v34 = vpop.permute.xlu0 %234  }
  0x96   :  { %513 = vst.msk [vmem:[%s1157_s1 + $0x4] ss:$8 sm:$0xf] %vm3_vm1, %v235_v34   ;;  %v248_v36 = vpop.permute.xlu1 %247  }
  0x97   :  { %514 = vst.msk [vmem:[%s1157_s1 + $0x4] ss:$8 sm:$0xf0] %vm3_vm1, %v235_v34  }
  0x98   :  { %517 = vst.msk [vmem:[%s1157_s1 + $0x44] ss:$8 sm:$0xf] %vm3_vm1, %v248_v36  }
  0x99   :  { %518 = vst.msk [vmem:[%s1157_s1 + $0x44] ss:$8 sm:$0xf0] %vm3_vm1, %v248_v36   ;;  %v376_v38 = vpop.permute.xlu2 %375  }
  0x9a   :  { %555 = vst.msk [vmem:[%s1157_s1 + $0xc6] ss:$8 sm:$0xf] %vm3_vm1, %v376_v38  }
  0x9b   :  { %556 = vst.msk [vmem:[%s1157_s1 + $0xc6] ss:$8 sm:$0xf0] %vm3_vm1, %v376_v38  }
  0x9d   :  { %v274_v37 = vpop.permute.xlu0 %273  }
  0x9e   :  { %525 = vst.msk [vmem:[%s1157_s1 + $0xc4] ss:$8 sm:$0xf] %vm3_vm1, %v274_v37   ;;  %v286_v39 = vpop.permute.xlu1 %285  }
  0x9f   :  { %526 = vst.msk [vmem:[%s1157_s1 + $0xc4] ss:$8 sm:$0xf0] %vm3_vm1, %v274_v37  }
  0xa0   :  { %528 = vst.msk [vmem:[%s1157_s1 + $0x5] ss:$8 sm:$0xf] %vm3_vm1, %v286_v39  }
  0xa1   :  { %529 = vst.msk [vmem:[%s1157_s1 + $0x5] ss:$8 sm:$0xf0] %vm3_vm1, %v286_v39   ;;  %v414_v42 = vpop.permute.xlu2 %413  }
  0xa2   :  { %566 = vst.msk [vmem:[%s1157_s1 + $0x87] ss:$8 sm:$0xf] %vm3_vm1, %v414_v42  }
  0xa3   :  { %567 = vst.msk [vmem:[%s1157_s1 + $0x87] ss:$8 sm:$0xf0] %vm3_vm1, %v414_v42  }
  0xa5   :  { %v312_v41 = vpop.permute.xlu0 %311  }
  0xa6   :  { %536 = vst.msk [vmem:[%s1157_s1 + $0x85] ss:$8 sm:$0xf] %vm3_vm1, %v312_v41   ;;  %v325_v43 = vpop.permute.xlu1 %324  }
  0xa7   :  { %537 = vst.msk [vmem:[%s1157_s1 + $0x85] ss:$8 sm:$0xf0] %vm3_vm1, %v312_v41  }
  0xa8   :  { %540 = vst.msk [vmem:[%s1157_s1 + $0xc5] ss:$8 sm:$0xf] %vm3_vm1, %v325_v43  }
  0xa9   :  { %541 = vst.msk [vmem:[%s1157_s1 + $0xc5] ss:$8 sm:$0xf0] %vm3_vm1, %v325_v43  }
  0xad   :  { %v350_v44 = vpop.permute.xlu0 %349  }
  0xae   :  { %547 = vst.msk [vmem:[%s1157_s1 + $0x46] ss:$8 sm:$0xf] %vm3_vm1, %v350_v44   ;;  %v363_v45 = vpop.permute.xlu1 %362  }
  0xaf   :  { %548 = vst.msk [vmem:[%s1157_s1 + $0x46] ss:$8 sm:$0xf0] %vm3_vm1, %v350_v44  }
  0xb0   :  { %551 = vst.msk [vmem:[%s1157_s1 + $0x86] ss:$8 sm:$0xf] %vm3_vm1, %v363_v45  }
  0xb1   :  { %552 = vst.msk [vmem:[%s1157_s1 + $0x86] ss:$8 sm:$0xf0] %vm3_vm1, %v363_v45  }
  0xb5   :  { %v388_v46 = vpop.permute.xlu0 %387  }
  0xb6   :  { %558 = vst.msk [vmem:[%s1157_s1 + $0x7] ss:$8 sm:$0xf] %vm3_vm1, %v388_v46   ;;  %v401_v47 = vpop.permute.xlu1 %400  }
  0xb7   :  { %559 = vst.msk [vmem:[%s1157_s1 + $0x7] ss:$8 sm:$0xf0] %vm3_vm1, %v388_v46  }
  0xb8   :  { %562 = vst.msk [vmem:[%s1157_s1 + $0x47] ss:$8 sm:$0xf] %vm3_vm1, %v401_v47  }
  0xb9   :  { %563 = vst.msk [vmem:[%s1157_s1 + $0x47] ss:$8 sm:$0xf0] %vm3_vm1, %v401_v47  }
  0xbd   :  { %v427_v49 = vpop.permute.xlu0 %426  }
  0xbe   :  { %570 = vst.msk [vmem:[%s1157_s1 + $0xc7] ss:$8 sm:$0xf] %vm3_vm1, %v427_v49  }
  0xbf   :  { %571 = vst.msk [vmem:[%s1157_s1 + $0xc7] ss:$8 sm:$0xf0] %vm3_vm1, %v427_v49  }

// kernel: a_call__.7
= control target key start
LH: loop header
LB: loop body
LE: loop exit
PB: predicated region body
PF: predicated region fallthrough
CT: control target
= control target key end

     0   :  { %s454_s9 = smov 0   ;;  %s501_s0 = inlined_call_operand.vmem [shape: f32[2,36,512], index: 0, kind: input, shape index: {}]   ;;  %s502_s1 = inlined_call_operand.vmem [shape: f32[2,8,36], index: 1, kind: input, shape index: {}]   ;;  %s503_s2 = inlined_call_operand.vmem [shape: f32[2,8,512], index: 2, kind: output, shape index: {}]  }
   0x1 LB: > { %s396_s10 = sadd.s32 4294967295, %s436_s9   ;;  %p400_p0 = scmp.ge.s32.totalorder %s436_s9, 1  ;;  %s436_s9 = sphi %s454_s9, %s12_s9  }
   0x2   : > { %p121_p1 = scmp.lt.s32.totalorder %s436_s9, 3 }
   0x4   : > { %p122_p2 = pnand %p400_p0, %p121_p1 }
   0x5   : > { %p147_p3 = scmp.lt.s32.totalorder (!%p122_p2), %s396_s10, 1 }
   0x6   : > { %125 = sbr.rel (%p122_p2) target bundleno = 435 (0x1b3), region = 28 }
   0xb   : > { %s505_s10 = smov (!%p147_p3, %s396_s10), 1  ;;  %vm186_vm0 = vcmask 1043456   ;;  %vm182_vm1 = vcmask 293888   ;;  %v438_v28 = vmov 512.0  }
   0xc   : > { %s416_s11 = smul.u32 160, %s505_s10  ;;  %s402_s15 = sshll.u32 %s505_s10, 3  ;;  %426 = vrcp.f32 %v438_v28 }
   0xd   : > { %s155_s18 = scalar_lea.vmem %s502_s1, %s402_s15  ;;  %s415_s19 = sshll.u32 %s505_s10, 5 }
   0xe   : > { %s468_s14 = scalar_lea.vmem %s501_s0, %s416_s11  ;;  %v161_v18 = vld [vmem:[%s155_s18] sm:$0xff]  ;;  %s160_s22 = scalar_lea.vmem %s503_s2, %s415_s19 }
   0xf   : > { %v180_v0 = vld [vmem:[%s468_s14 + $0x90] sm:$0xf]  ;;  %v181_v2 = vld [vmem:[%s468_s14 + $0x98] sm:$0xf]  ;;  %v178_v3 = vld [vmem:[%s468_s14 + $0x80] sm:$0xf] }
  0x10   : > { %v176_v1 = vld [vmem:[%s468_s14 + $0x70] sm:$0xff]  ;;  %409 = vmatpush.msk.msra.mxu2 %vm186_vm0, %v180_v0  ;;  %411 = vmatpush.msk.msra.mxu3 %vm186_vm0, %v181_v2  ;;  %v179_v4 = vld [vmem:[%s468_s14 + $0x88] sm:$0xf]  ;;  %v177_v6 = vld [vmem:[%s468_s14 + $0x78] sm:$0xff] }
  0x11   : > { %v172_v5 = vld [vmem:[%s468_s14 + $0x50] sm:$0xff]  ;;  %405 = vmatpush.msk.msra.mxu0 %vm186_vm0, %v178_v3  ;;  %407 = vmatpush.msk.msra.mxu1 %vm186_vm0, %v179_v4  ;;  %v174_v7 = vld [vmem:[%s468_s14 + $0x60] sm:$0xff]  ;;  %v175_v8 = vld [vmem:[%s468_s14 + $0x68] sm:$0xff] }
  0x12   : > { %251 = vmatpush.msra.mxu2 %v176_v1  ;;  %271 = vmatpush.msra.mxu3 %v177_v6  ;;  %v173_v9 = vld [vmem:[%s468_s14 + $0x58] sm:$0xff]  ;;  %v170_v10 = vld [vmem:[%s468_s14 + $0x40] sm:$0xff]  ;;  %v168_v11 = vld [vmem:[%s468_s14 + $0x30] sm:$0xff]  ;;  %v427_v29 = vpop.eup %426 }
  0x13   : > { %211 = vmatpush.msra.mxu0 %v174_v7  ;;  %231 = vmatpush.msra.mxu1 %v175_v8  ;;  %v171_v12 = vld [vmem:[%s468_s14 + $0x48] sm:$0xff]  ;;  %v169_v13 = vld [vmem:[%s468_s14 + $0x38] sm:$0xff]  ;;  %v166_v14 = vld [vmem:[%s468_s14 + $0x20] sm:$0xff]  ;;  %v285_v30 = vmul.f32 512.0, %v427_v29  ;;  %vm289_vm2 = vweird.f32 %v427_v29 }
  0x14   : > { %252 = vmatpush.msra.mxu2 %v172_v5  ;;  %272 = vmatpush.msra.mxu3 %v173_v9  ;;  %v167_v15 = vld [vmem:[%s468_s14 + $0x28] sm:$0xff]  ;;  %v164_v16 = vld [vmem:[%s468_s14 + $0x10] sm:$0xff]  ;;  %v165_v17 = vld [vmem:[%s468_s14 + $0x18] sm:$0xff] }
  0x15   : > { %212 = vmatpush.msra.mxu0 %v170_v10  ;;  %232 = vmatpush.msra.mxu1 %v171_v12  ;;  %v162_v19 = vld [vmem:[%s468_s14] sm:$0xff]  ;;  %v163_v20 = vld [vmem:[%s468_s14 + $0x8] sm:$0xff]  ;;  %v286_v31 = vsub.f32 1.0, %v285_v30 }
  0x16   : > { %253 = vmatpush.msra.mxu2 %v168_v11  ;;  %273 = vmatpush.msra.mxu3 %v169_v13 }
  0x17   : > { %213 = vmatpush.msra.mxu0 %v166_v14  ;;  %233 = vmatpush.msra.mxu1 %v167_v15  ;;  %v287_v32 = vmul.f32 %v427_v29, %v286_v31 }
  0x18   : > { %254 = vmatpush.msra.mxu2 %v164_v16  ;;  %274 = vmatpush.msra.mxu3 %v165_v17 }
  0x19   : > { %410 = vmatmul.msk.f32.vlgmr.msra.gmra.mxu2 %vm182_vm1, %v161_v18  ;;  %412 = vmatmul.msk.f32.vlgmr.msra.gmra.mxu3 %vm182_vm1, %v161_v18  ;;  %v288_v33 = vadd.f32 %v427_v29, %v287_v32 }
  0x1a   : > { %214 = vmatpush.msra.mxu0 %v162_v19  ;;  %234 = vmatpush.msra.mxu1 %v163_v20 }
  0x1b   : > { %406 = vmatmul.msk.f32.vlgmr.msra.gmra.mxu0 %vm182_vm1, %v161_v18  ;;  %408 = vmatmul.msk.f32.vlgmr.msra.gmra.mxu1 %vm182_vm1, %v161_v18  ;;  %v290_v34 = vsel %vm289_vm2, %v427_v29, %v288_v33 }
  0x98   : > { %v216_v21 = vpop.f32.mrf.mxu0  ;;  %v236_v22 = vpop.f32.mrf.mxu1 }
  0x99   : > { %v279_v23 = vadd.f32 %v236_v22, %v216_v21 }
  0x9c   : > { %v256_v24 = vpop.f32.mrf.mxu2  ;;  %v276_v25 = vpop.f32.mrf.mxu3 }
  0x9d   : > { %v280_v26 = vadd.f32 %v279_v23, %v256_v24 }
  0x9f   : > { %v281_v27 = vadd.f32 %v280_v26, %v276_v25 }
  0xa1   : > { %282 = vadd.xlane.f32.xlu0 %v281_v27 }
 0x114   : > { %v283_v35 = vpop.xlane.xlu0 %282 }
 0x115   : > { %v291_v36 = vmul.f32 %v290_v34, %v283_v35 }
 0x117   : > { %v292_v37 = vsub.f32 %v216_v21, %v291_v36  ;;  %v293_v38 = vsub.f32 %v236_v22, %v291_v36  ;;  %v294_v39 = vsub.f32 %v256_v24, %v291_v36  ;;  %v295_v40 = vsub.f32 %v276_v25, %v291_v36 }
 0x119   : > { %v296_v41 = vmul.f32 %v292_v37, %v292_v37  ;;  %v297_v42 = vmul.f32 %v293_v38, %v293_v38  ;;  %v298_v43 = vmul.f32 %v294_v39, %v294_v39  ;;  %v299_v45 = vmul.f32 %v295_v40, %v295_v40 }
 0x11b   : > { %v300_v44 = vadd.f32 %v297_v42, %v296_v41 }
 0x11d   : > { %v301_v46 = vadd.f32 %v300_v44, %v298_v43 }
 0x11f   : > { %v302_v47 = vadd.f32 %v301_v46, %v299_v45 }
 0x121   : > { %303 = vadd.xlane.f32.xlu0 %v302_v47 }
 0x194   : > { %v304_v48 = vpop.xlane.xlu0 %303 }
 0x195   : > { %v305_v49 = vmul.f32 %v304_v48, %v290_v34 }
 0x197   : > { %v306_v50 = vadd.f32 1e-05, %v305_v49 }
 0x199   : > { %428 = vrsqrt.f32 %v306_v50  ;;  %vm313_vm4 = vweird.f32 %v306_v50 }
 0x19f   : > { %v429_v51 = vpop.eup %428 }
 0x1a0   : > { %v308_v52 = vmul.f32 %v429_v51, %v306_v50  ;;  %vm314_vm3 = vweird.f32 %v429_v51 }
 0x1a1   : > { %vm315_vm5 = vmor %vm313_vm4, %vm314_vm3 }
 0x1a2   : > { %v309_v53 = vmul.f32 %v429_v51, %v308_v52 }
 0x1a4   : > { %v310_v54 = vmul.f32 0.5, %v309_v53 }
 0x1a6   : > { %v311_v55 = vsub.f32 1.5, %v310_v54 }
 0x1a8   : > { %v312_v56 = vmul.f32 %v429_v51, %v311_v55 }
 0x1aa   : > { %v316_v57 = vsel %vm315_vm5, %v429_v51, %v312_v56 }
 0x1ab   : > { %v317_v58 = vmul.f32 %v316_v57, %v292_v37  ;;  %v318_v59 = vmul.f32 %v316_v57, %v293_v38  ;;  %v319_v60 = vmul.f32 %v316_v57, %v294_v39  ;;  %v320_v61 = vmul.f32 %v316_v57, %v295_v40 }
 0x1ad   : > { %v321_v62 = vmax.f32 %v317_v58, 0.0  ;;  %v322_v63 = vmax.f32 %v318_v59, 0.0  ;;  %v323_v0 = vmax.f32 %v319_v60, 0.0  ;;  %v324_v1 = vmax.f32 %v320_v61, 0.0 }
 0x1af   : > { %325 = vst [vmem:[%s160_s22] sm:$0xff] %v321_v62 }
 0x1b0   : > { %326 = vst [vmem:[%s160_s22 + $0x8] sm:$0xff] %v322_v63 }
 0x1b1   : > { %327 = vst [vmem:[%s160_s22 + $0x10] sm:$0xff] %v323_v0 }
 0x1b2   : > { %328 = vst [vmem:[%s160_s22 + $0x18] sm:$0xff] %v324_v1 }
 0x1b3 PF: > { %s12_s9 = sadd.s32 1, %s436_s9  }
 0x1b4   : > { %p9_p4 = scmp.ge.s32.totalorder %s12_s9, 4  }
 0x1b6   :  { %11 = sbr.rel (!%p9_p4) target bundleno = 1 (0x1), region = 61 }

// kernel: a_call__.6
= control target key start
LH: loop header
LB: loop body
LE: loop exit
PB: predicated region body
PF: predicated region fallthrough
CT: control target
= control target key end

     0   :  { %vm36_vm0 = vcmask 1043456   ;;  %vm32_vm1 = vcmask 293888   ;;  %s243_s0 = inlined_call_operand.vmem [shape: f32[1,36,512], index: 0, kind: input, shape index: {}]   ;;  %s244_s1 = inlined_call_operand.vmem [shape: f32[1,4,36], index: 1, kind: input, shape index: {}]   ;;  %s245_s2 = inlined_call_operand.vmem [shape: f32[1,4,512], index: 2, kind: output, shape index: {}]  }
   0x1   :  { %v31_v0 = vld [vmem:[%s243_s0 + $0x98] sm:$0xf]  ;;  %v30_v1 = vld [vmem:[%s243_s0 + $0x90] sm:$0xf]  ;;  %v29_v4 = vld [vmem:[%s243_s0 + $0x88] sm:$0xf] }
   0x2   :  { %v27_v2 = vld [vmem:[%s243_s0 + $0x78] sm:$0xff]  ;;  %151 = vmatpush.msk.msra.mxu3 %vm36_vm0, %v31_v0  ;;  %149 = vmatpush.msk.msra.mxu2 %vm36_vm0, %v30_v1  ;;  %v26_v3 = vld [vmem:[%s243_s0 + $0x70] sm:$0xff]  ;;  %v28_v7 = vld [vmem:[%s243_s0 + $0x80] sm:$0xf] }
   0x3   :  { %v23_v5 = vld [vmem:[%s243_s0 + $0x58] sm:$0xff]  ;;  %147 = vmatpush.msk.msra.mxu1 %vm36_vm0, %v29_v4  ;;  %v22_v6 = vld [vmem:[%s243_s0 + $0x50] sm:$0xff]  ;;  %v25_v9 = vld [vmem:[%s243_s0 + $0x68] sm:$0xff]  ;;  %145 = vmatpush.msk.msra.mxu0 %vm36_vm0, %v28_v7 }
   0x4   :  { %121 = vmatpush.msra.mxu3 %v27_v2  ;;  %101 = vmatpush.msra.mxu2 %v26_v3  ;;  %v19_v8 = vld [vmem:[%s243_s0 + $0x38] sm:$0xff]  ;;  %v18_v10 = vld [vmem:[%s243_s0 + $0x30] sm:$0xff]  ;;  %v24_v11 = vld [vmem:[%s243_s0 + $0x60] sm:$0xff] }
   0x5   :  { %81 = vmatpush.msra.mxu1 %v25_v9  ;;  %v21_v12 = vld [vmem:[%s243_s0 + $0x48] sm:$0xff]  ;;  %v20_v13 = vld [vmem:[%s243_s0 + $0x40] sm:$0xff]  ;;  %v15_v15 = vld [vmem:[%s243_s0 + $0x18] sm:$0xff]  ;;  %61 = vmatpush.msra.mxu0 %v24_v11 }
   0x6   :  { %122 = vmatpush.msra.mxu3 %v23_v5  ;;  %102 = vmatpush.msra.mxu2 %v22_v6  ;;  %v17_v14 = vld [vmem:[%s243_s0 + $0x28] sm:$0xff]  ;;  %v14_v16 = vld [vmem:[%s243_s0 + $0x10] sm:$0xff]  ;;  %v11_v17 = vld [vmem:[%s244_s1] sm:$0xf] }
   0x7   :  { %82 = vmatpush.msra.mxu1 %v21_v12  ;;  %62 = vmatpush.msra.mxu0 %v20_v13  ;;  %v16_v18 = vld [vmem:[%s243_s0 + $0x20] sm:$0xff]  ;;  %v13_v19 = vld [vmem:[%s243_s0 + $0x8] sm:$0xff] }
   0x8   :  { %123 = vmatpush.msra.mxu3 %v19_v8  ;;  %103 = vmatpush.msra.mxu2 %v18_v10  ;;  %v12_v20 = vld [vmem:[%s243_s0] sm:$0xff] }
   0x9   :  { %83 = vmatpush.msra.mxu1 %v17_v14  ;;  %63 = vmatpush.msra.mxu0 %v16_v18 }
   0xa   :  { %124 = vmatpush.msra.mxu3 %v15_v15  ;;  %104 = vmatpush.msra.mxu2 %v14_v16 }
   0xb   :  { %152 = vmatmul.msk.f32.vlgmr.msra.gmra.mxu3 %vm32_vm1, %v11_v17  ;;  %150 = vmatmul.msk.f32.vlgmr.msra.gmra.mxu2 %vm32_vm1, %v11_v17 }
   0xc   :  { %84 = vmatpush.msra.mxu1 %v13_v19  ;;  %64 = vmatpush.msra.mxu0 %v12_v20 }
   0xd   :  { %148 = vmatmul.msk.f32.vlgmr.msra.gmra.mxu1 %vm32_vm1, %v11_v17  ;;  %146 = vmatmul.msk.f32.vlgmr.msra.gmra.mxu0 %vm32_vm1, %v11_v17 }
  0x8a   :  { %v86_v21 = vpop.f32.mrf.mxu1  ;;  %v66_v23 = vpop.f32.mrf.mxu0 }
  0x8b   :  { %v133_v22 = vrot.slane %v86_v21, 4 }
  0x8d   :  { %v135_v24 = vsel %vm36_vm0, %v66_v23, %v133_v22 }
  0x8e   :  { %v126_v25 = vpop.f32.mrf.mxu3  ;;  %139 = vst [vmem:[%s245_s2] sm:$0xff] %v135_v24  ;;  %v106_v26 = vpop.f32.mrf.mxu2 }
  0x8f   :  { %v134_v27 = vrot.slane %v126_v25, 4 }
  0x91   :  { %v136_v28 = vsel %vm36_vm0, %v106_v26, %v134_v27 }
  0x92   :  { %140 = vst [vmem:[%s245_s2 + $0x8] sm:$0xff] %v136_v28 }

// kernel: a_call__.9
= control target key start
LH: loop header
LB: loop body
LE: loop exit
PB: predicated region body
PF: predicated region fallthrough
CT: control target
= control target key end

     0   :  { %s453_s9 = smov 0   ;;  %s516_s0 = inlined_call_operand.vmem [shape: f32[2,72,512], index: 0, kind: input, shape index: {}]   ;;  %s517_s1 = inlined_call_operand.vmem [shape: f32[2,8,72], index: 1, kind: input, shape index: {}]   ;;  %s518_s2 = inlined_call_operand.vmem [shape: f32[2,8,512], index: 2, kind: output, shape index: {}]  }
   0x1 LB: > { %s399_s10 = sadd.s32 4294967295, %s435_s9   ;;  %p403_p0 = scmp.ge.s32.totalorder %s435_s9, 1  ;;  %s435_s9 = sphi %s453_s9, %s12_s9  }
   0x2   : > { %p121_p1 = scmp.lt.s32.totalorder %s435_s9, 3 }
   0x4   : > { %p122_p2 = pnand %p403_p0, %p121_p1 }
   0x5   : > { %p147_p3 = scmp.lt.s32.totalorder (!%p122_p2), %s399_s10, 1 }
   0x6   : > { %125 = sbr.rel (%p122_p2) target bundleno = 443 (0x1bb), region = 28 }
   0xb   : > { %s520_s10 = smov (!%p147_p3, %s399_s10), 1  ;;  %vm198_vm0 = vcmask 588800   ;;  %v437_v44 = vmov 512.0  }
   0xc   : > { %s415_s11 = smul.u32 288, %s520_s10  ;;  %s405_s15 = sshll.u32 %s520_s10, 3  ;;  %425 = vrcp.f32 %v437_v44 }
   0xd   : > { %s155_s18 = scalar_lea.vmem %s517_s1, %s405_s15  ;;  %s414_s19 = sshll.u32 %s520_s10, 5 }
   0xe   : > { %s467_s14 = scalar_lea.vmem %s516_s0, %s415_s11  ;;  %v161_v34 = vld [vmem:[%s155_s18] sm:$0xff]  ;;  %s160_s22 = scalar_lea.vmem %s518_s2, %s414_s19 }
   0xf   : > { %v196_v0 = vld [vmem:[%s467_s14 + $0x110] sm:$0xff]  ;;  %v197_v2 = vld [vmem:[%s467_s14 + $0x118] sm:$0xff]  ;;  %v194_v3 = vld [vmem:[%s467_s14 + $0x100] sm:$0xff] }
  0x10   : > { %v192_v1 = vld [vmem:[%s467_s14 + $0xf0] sm:$0xff]  ;;  %249 = vmatpush.msra.mxu2 %v196_v0  ;;  %269 = vmatpush.msra.mxu3 %v197_v2  ;;  %v195_v4 = vld [vmem:[%s467_s14 + $0x108] sm:$0xff]  ;;  %v193_v6 = vld [vmem:[%s467_s14 + $0xf8] sm:$0xff] }
  0x11   : > { %v188_v5 = vld [vmem:[%s467_s14 + $0xd0] sm:$0xff]  ;;  %209 = vmatpush.msra.mxu0 %v194_v3  ;;  %229 = vmatpush.msra.mxu1 %v195_v4  ;;  %v190_v7 = vld [vmem:[%s467_s14 + $0xe0] sm:$0xff]  ;;  %v191_v8 = vld [vmem:[%s467_s14 + $0xe8] sm:$0xff] }
  0x12   : > { %250 = vmatpush.msra.mxu2 %v192_v1  ;;  %270 = vmatpush.msra.mxu3 %v193_v6  ;;  %v189_v9 = vld [vmem:[%s467_s14 + $0xd8] sm:$0xff]  ;;  %v186_v10 = vld [vmem:[%s467_s14 + $0xc0] sm:$0xff]  ;;  %v184_v11 = vld [vmem:[%s467_s14 + $0xb0] sm:$0xff]  ;;  %v426_v45 = vpop.eup %425 }
  0x13   : > { %210 = vmatpush.msra.mxu0 %v190_v7  ;;  %230 = vmatpush.msra.mxu1 %v191_v8  ;;  %v187_v12 = vld [vmem:[%s467_s14 + $0xc8] sm:$0xff]  ;;  %v185_v13 = vld [vmem:[%s467_s14 + $0xb8] sm:$0xff]  ;;  %v182_v14 = vld [vmem:[%s467_s14 + $0xa0] sm:$0xff]  ;;  %v288_v46 = vmul.f32 512.0, %v426_v45  ;;  %vm292_vm1 = vweird.f32 %v426_v45 }
  0x14   : > { %251 = vmatpush.msra.mxu2 %v188_v5  ;;  %271 = vmatpush.msra.mxu3 %v189_v9  ;;  %v183_v15 = vld [vmem:[%s467_s14 + $0xa8] sm:$0xff]  ;;  %v180_v16 = vld [vmem:[%s467_s14 + $0x90] sm:$0xff]  ;;  %v181_v17 = vld [vmem:[%s467_s14 + $0x98] sm:$0xff] }
  0x15   : > { %211 = vmatpush.msra.mxu0 %v186_v10  ;;  %231 = vmatpush.msra.mxu1 %v187_v12  ;;  %v178_v18 = vld [vmem:[%s467_s14 + $0x80] sm:$0xff]  ;;  %v179_v19 = vld [vmem:[%s467_s14 + $0x88] sm:$0xff]  ;;  %v176_v20 = vld [vmem:[%s467_s14 + $0x70] sm:$0xff]  ;;  %v289_v47 = vsub.f32 1.0, %v288_v46 }
  0x16   : > { %252 = vmatpush.msra.mxu2 %v184_v11  ;;  %272 = vmatpush.msra.mxu3 %v185_v13  ;;  %v177_v21 = vld [vmem:[%s467_s14 + $0x78] sm:$0xff]  ;;  %v174_v22 = vld [vmem:[%s467_s14 + $0x60] sm:$0xff]  ;;  %v175_v23 = vld [vmem:[%s467_s14 + $0x68] sm:$0xff] }
  0x17   : > { %212 = vmatpush.msra.mxu0 %v182_v14  ;;  %232 = vmatpush.msra.mxu1 %v183_v15  ;;  %v172_v24 = vld [vmem:[%s467_s14 + $0x50] sm:$0xff]  ;;  %v173_v25 = vld [vmem:[%s467_s14 + $0x58] sm:$0xff]  ;;  %v170_v26 = vld [vmem:[%s467_s14 + $0x40] sm:$0xff]  ;;  %v290_v48 = vmul.f32 %v426_v45, %v289_v47 }
  0x18   : > { %253 = vmatpush.msra.mxu2 %v180_v16  ;;  %273 = vmatpush.msra.mxu3 %v181_v17  ;;  %v171_v27 = vld [vmem:[%s467_s14 + $0x48] sm:$0xff]  ;;  %v168_v28 = vld [vmem:[%s467_s14 + $0x30] sm:$0xff]  ;;  %v169_v29 = vld [vmem:[%s467_s14 + $0x38] sm:$0xff] }
  0x19   : > { %213 = vmatpush.msra.mxu0 %v178_v18  ;;  %233 = vmatpush.msra.mxu1 %v179_v19  ;;  %v166_v30 = vld [vmem:[%s467_s14 + $0x20] sm:$0xff]  ;;  %v167_v31 = vld [vmem:[%s467_s14 + $0x28] sm:$0xff]  ;;  %v164_v32 = vld [vmem:[%s467_s14 + $0x10] sm:$0xff]  ;;  %v291_v49 = vadd.f32 %v426_v45, %v290_v48 }
  0x1a   : > { %254 = vmatpush.msra.mxu2 %v176_v20  ;;  %274 = vmatpush.msra.mxu3 %v177_v21  ;;  %v165_v33 = vld [vmem:[%s467_s14 + $0x18] sm:$0xff]  ;;  %v162_v35 = vld [vmem:[%s467_s14] sm:$0xff]  ;;  %v163_v36 = vld [vmem:[%s467_s14 + $0x8] sm:$0xff] }
  0x1b   : > { %214 = vmatpush.msra.mxu0 %v174_v22  ;;  %234 = vmatpush.msra.mxu1 %v175_v23  ;;  %v293_v50 = vsel %vm292_vm1, %v426_v45, %v291_v49 }
  0x1c   : > { %255 = vmatpush.msra.mxu2 %v172_v24  ;;  %275 = vmatpush.msra.mxu3 %v173_v25 }
  0x1d   : > { %215 = vmatpush.msra.mxu0 %v170_v26  ;;  %235 = vmatpush.msra.mxu1 %v171_v27 }
  0x1e   : > { %256 = vmatpush.msra.mxu2 %v168_v28  ;;  %276 = vmatpush.msra.mxu3 %v169_v29 }
  0x1f   : > { %216 = vmatpush.msra.mxu0 %v166_v30  ;;  %236 = vmatpush.msra.mxu1 %v167_v31 }
  0x20   : > { %257 = vmatpush.msra.mxu2 %v164_v32  ;;  %277 = vmatpush.msra.mxu3 %v165_v33 }
  0x21   : > { %410 = vmatmul.msk.f32.vlgmr.msra.gmra.mxu2 %vm198_vm0, %v161_v34  ;;  %411 = vmatmul.msk.f32.vlgmr.msra.gmra.mxu3 %vm198_vm0, %v161_v34 }
  0x22   : > { %217 = vmatpush.msra.mxu0 %v162_v35  ;;  %237 = vmatpush.msra.mxu1 %v163_v36 }
  0x23   : > { %408 = vmatmul.msk.f32.vlgmr.msra.gmra.mxu0 %vm198_vm0, %v161_v34  ;;  %409 = vmatmul.msk.f32.vlgmr.msra.gmra.mxu1 %vm198_vm0, %v161_v34 }
  0xa0   : > { %v219_v37 = vpop.f32.mrf.mxu0  ;;  %v239_v38 = vpop.f32.mrf.mxu1 }
  0xa1   : > { %v282_v39 = vadd.f32 %v239_v38, %v219_v37 }
  0xa4   : > { %v259_v40 = vpop.f32.mrf.mxu2  ;;  %v279_v41 = vpop.f32.mrf.mxu3 }
  0xa5   : > { %v283_v42 = vadd.f32 %v282_v39, %v259_v40 }
  0xa7   : > { %v284_v43 = vadd.f32 %v283_v42, %v279_v41 }
  0xa9   : > { %285 = vadd.xlane.f32.xlu0 %v284_v43 }
 0x11c   : > { %v286_v51 = vpop.xlane.xlu0 %285 }
 0x11d   : > { %v294_v52 = vmul.f32 %v293_v50, %v286_v51 }
 0x11f   : > { %v295_v53 = vsub.f32 %v219_v37, %v294_v52  ;;  %v296_v54 = vsub.f32 %v239_v38, %v294_v52  ;;  %v297_v55 = vsub.f32 %v259_v40, %v294_v52  ;;  %v298_v56 = vsub.f32 %v279_v41, %v294_v52 }
 0x121   : > { %v299_v57 = vmul.f32 %v295_v53, %v295_v53  ;;  %v300_v58 = vmul.f32 %v296_v54, %v296_v54  ;;  %v301_v59 = vmul.f32 %v297_v55, %v297_v55  ;;  %v302_v61 = vmul.f32 %v298_v56, %v298_v56 }
 0x123   : > { %v303_v60 = vadd.f32 %v300_v58, %v299_v57 }
 0x125   : > { %v304_v62 = vadd.f32 %v303_v60, %v301_v59 }
 0x127   : > { %v305_v63 = vadd.f32 %v304_v62, %v302_v61 }
 0x129   : > { %306 = vadd.xlane.f32.xlu0 %v305_v63 }
 0x19c   : > { %v307_v0 = vpop.xlane.xlu0 %306 }
 0x19d   : > { %v308_v1 = vmul.f32 %v307_v0, %v293_v50 }
 0x19f   : > { %v309_v2 = vadd.f32 1e-05, %v308_v1 }
 0x1a1   : > { %427 = vrsqrt.f32 %v309_v2  ;;  %vm316_vm3 = vweird.f32 %v309_v2 }
 0x1a7   : > { %v428_v3 = vpop.eup %427 }
 0x1a8   : > { %v311_v4 = vmul.f32 %v428_v3, %v309_v2  ;;  %vm317_vm2 = vweird.f32 %v428_v3 }
 0x1a9   : > { %vm318_vm4 = vmor %vm316_vm3, %vm317_vm2 }
 0x1aa   : > { %v312_v5 = vmul.f32 %v428_v3, %v311_v4 }
 0x1ac   : > { %v313_v6 = vmul.f32 0.5, %v312_v5 }
 0x1ae   : > { %v314_v7 = vsub.f32 1.5, %v313_v6 }
 0x1b0   : > { %v315_v8 = vmul.f32 %v428_v3, %v314_v7 }
 0x1b2   : > { %v319_v9 = vsel %vm318_vm4, %v428_v3, %v315_v8 }
 0x1b3   : > { %v320_v10 = vmul.f32 %v319_v9, %v295_v53  ;;  %v321_v11 = vmul.f32 %v319_v9, %v296_v54  ;;  %v322_v12 = vmul.f32 %v319_v9, %v297_v55  ;;  %v323_v13 = vmul.f32 %v319_v9, %v298_v56 }
 0x1b5   : > { %v324_v14 = vmax.f32 %v320_v10, 0.0  ;;  %v325_v15 = vmax.f32 %v321_v11, 0.0  ;;  %v326_v16 = vmax.f32 %v322_v12, 0.0  ;;  %v327_v17 = vmax.f32 %v323_v13, 0.0 }
 0x1b7   : > { %328 = vst [vmem:[%s160_s22] sm:$0xff] %v324_v14 }
 0x1b8   : > { %329 = vst [vmem:[%s160_s22 + $0x8] sm:$0xff] %v325_v15 }
 0x1b9   : > { %330 = vst [vmem:[%s160_s22 + $0x10] sm:$0xff] %v326_v16 }
 0x1ba   : > { %331 = vst [vmem:[%s160_s22 + $0x18] sm:$0xff] %v327_v17 }
 0x1bb PF: > { %s12_s9 = sadd.s32 1, %s435_s9  }
 0x1bc   : > { %p9_p4 = scmp.ge.s32.totalorder %s12_s9, 4  }
 0x1be   :  { %11 = sbr.rel (!%p9_p4) target bundleno = 1 (0x1), region = 61 }

// kernel: a_call__.8
= control target key start
LH: loop header
LB: loop body
LE: loop exit
PB: predicated region body
PF: predicated region fallthrough
CT: control target
= control target key end

     0   :  { %vm68_vm0 = vcmask 1043456   ;;  %vm64_vm1 = vcmask 818176   ;;  %v228_v60 = vmov 512.0   ;;  %s415_s0 = inlined_call_operand.vmem [shape: f32[1,100,512], index: 0, kind: input, shape index: {}]   ;;  %s416_s1 = inlined_call_operand.vmem [shape: f32[1,8,100], index: 1, kind: input, shape index: {}]   ;;  %s417_s2 = inlined_call_operand.vmem [shape: f32[1,8,512], index: 2, kind: output, shape index: {}]  }
   0x1   :  { %v62_v0 = vld [vmem:[%s415_s0 + $0x190] sm:$0xf]  ;;  %v63_v2 = vld [vmem:[%s415_s0 + $0x198] sm:$0xf]  ;;  %v60_v3 = vld [vmem:[%s415_s0 + $0x180] sm:$0xf]  ;;  %224 = vrcp.f32 %v228_v60 }
   0x2   :  { %v58_v1 = vld [vmem:[%s415_s0 + $0x170] sm:$0xff]  ;;  %219 = vmatpush.msk.msra.mxu2 %vm68_vm0, %v62_v0  ;;  %221 = vmatpush.msk.msra.mxu3 %vm68_vm0, %v63_v2  ;;  %v61_v4 = vld [vmem:[%s415_s0 + $0x188] sm:$0xf]  ;;  %v59_v6 = vld [vmem:[%s415_s0 + $0x178] sm:$0xff] }
   0x3   :  { %v54_v5 = vld [vmem:[%s415_s0 + $0x150] sm:$0xff]  ;;  %215 = vmatpush.msk.msra.mxu0 %vm68_vm0, %v60_v3  ;;  %217 = vmatpush.msk.msra.mxu1 %vm68_vm0, %v61_v4  ;;  %v56_v7 = vld [vmem:[%s415_s0 + $0x160] sm:$0xff]  ;;  %v57_v8 = vld [vmem:[%s415_s0 + $0x168] sm:$0xff] }
   0x4   :  { %125 = vmatpush.msra.mxu2 %v58_v1  ;;  %145 = vmatpush.msra.mxu3 %v59_v6  ;;  %v55_v9 = vld [vmem:[%s415_s0 + $0x158] sm:$0xff]  ;;  %v52_v10 = vld [vmem:[%s415_s0 + $0x140] sm:$0xff]  ;;  %v50_v11 = vld [vmem:[%s415_s0 + $0x130] sm:$0xff] }
   0x5   :  { %85 = vmatpush.msra.mxu0 %v56_v7  ;;  %105 = vmatpush.msra.mxu1 %v57_v8  ;;  %v53_v12 = vld [vmem:[%s415_s0 + $0x148] sm:$0xff]  ;;  %v51_v13 = vld [vmem:[%s415_s0 + $0x138] sm:$0xff]  ;;  %v48_v14 = vld [vmem:[%s415_s0 + $0x120] sm:$0xff] }
   0x6   :  { %126 = vmatpush.msra.mxu2 %v54_v5  ;;  %146 = vmatpush.msra.mxu3 %v55_v9  ;;  %v49_v15 = vld [vmem:[%s415_s0 + $0x128] sm:$0xff]  ;;  %v46_v16 = vld [vmem:[%s415_s0 + $0x110] sm:$0xff]  ;;  %v47_v17 = vld [vmem:[%s415_s0 + $0x118] sm:$0xff] }
   0x7   :  { %86 = vmatpush.msra.mxu0 %v52_v10  ;;  %106 = vmatpush.msra.mxu1 %v53_v12  ;;  %v44_v18 = vld [vmem:[%s415_s0 + $0x100] sm:$0xff]  ;;  %v45_v19 = vld [vmem:[%s415_s0 + $0x108] sm:$0xff]  ;;  %v42_v20 = vld [vmem:[%s415_s0 + $0xf0] sm:$0xff]  ;;  %v225_v61 = vpop.eup %224 }
   0x8   :  { %127 = vmatpush.msra.mxu2 %v50_v11  ;;  %147 = vmatpush.msra.mxu3 %v51_v13  ;;  %v43_v21 = vld [vmem:[%s415_s0 + $0xf8] sm:$0xff]  ;;  %v40_v22 = vld [vmem:[%s415_s0 + $0xe0] sm:$0xff]  ;;  %v41_v23 = vld [vmem:[%s415_s0 + $0xe8] sm:$0xff]  ;;  %v167_v62 = vmul.f32 512.0, %v225_v61  ;;  %vm171_vm2 = vweird.f32 %v225_v61 }
   0x9   :  { %87 = vmatpush.msra.mxu0 %v48_v14  ;;  %107 = vmatpush.msra.mxu1 %v49_v15  ;;  %v38_v24 = vld [vmem:[%s415_s0 + $0xd0] sm:$0xff]  ;;  %v39_v25 = vld [vmem:[%s415_s0 + $0xd8] sm:$0xff]  ;;  %v36_v26 = vld [vmem:[%s415_s0 + $0xc0] sm:$0xff] }
   0xa   :  { %128 = vmatpush.msra.mxu2 %v46_v16  ;;  %148 = vmatpush.msra.mxu3 %v47_v17  ;;  %v37_v27 = vld [vmem:[%s415_s0 + $0xc8] sm:$0xff]  ;;  %v34_v28 = vld [vmem:[%s415_s0 + $0xb0] sm:$0xff]  ;;  %v35_v29 = vld [vmem:[%s415_s0 + $0xb8] sm:$0xff]  ;;  %v168_v63 = vsub.f32 1.0, %v167_v62 }
   0xb   :  { %88 = vmatpush.msra.mxu0 %v44_v18  ;;  %108 = vmatpush.msra.mxu1 %v45_v19  ;;  %v32_v30 = vld [vmem:[%s415_s0 + $0xa0] sm:$0xff]  ;;  %v33_v31 = vld [vmem:[%s415_s0 + $0xa8] sm:$0xff]  ;;  %v30_v32 = vld [vmem:[%s415_s0 + $0x90] sm:$0xff] }
   0xc   :  { %129 = vmatpush.msra.mxu2 %v42_v20  ;;  %149 = vmatpush.msra.mxu3 %v43_v21  ;;  %v31_v33 = vld [vmem:[%s415_s0 + $0x98] sm:$0xff]  ;;  %v28_v34 = vld [vmem:[%s415_s0 + $0x80] sm:$0xff]  ;;  %v29_v35 = vld [vmem:[%s415_s0 + $0x88] sm:$0xff]  ;;  %v169_v0 = vmul.f32 %v225_v61, %v168_v63 }
   0xd   :  { %89 = vmatpush.msra.mxu0 %v40_v22  ;;  %109 = vmatpush.msra.mxu1 %v41_v23  ;;  %v26_v36 = vld [vmem:[%s415_s0 + $0x70] sm:$0xff]  ;;  %v27_v37 = vld [vmem:[%s415_s0 + $0x78] sm:$0xff]  ;;  %v24_v38 = vld [vmem:[%s415_s0 + $0x60] sm:$0xff] }
   0xe   :  { %130 = vmatpush.msra.mxu2 %v38_v24  ;;  %150 = vmatpush.msra.mxu3 %v39_v25  ;;  %v25_v39 = vld [vmem:[%s415_s0 + $0x68] sm:$0xff]  ;;  %v22_v40 = vld [vmem:[%s415_s0 + $0x50] sm:$0xff]  ;;  %v23_v41 = vld [vmem:[%s415_s0 + $0x58] sm:$0xff]  ;;  %v170_v1 = vadd.f32 %v225_v61, %v169_v0 }
   0xf   :  { %90 = vmatpush.msra.mxu0 %v36_v26  ;;  %110 = vmatpush.msra.mxu1 %v37_v27  ;;  %v20_v42 = vld [vmem:[%s415_s0 + $0x40] sm:$0xff]  ;;  %v21_v43 = vld [vmem:[%s415_s0 + $0x48] sm:$0xff]  ;;  %v18_v44 = vld [vmem:[%s415_s0 + $0x30] sm:$0xff] }
  0x10   :  { %131 = vmatpush.msra.mxu2 %v34_v28  ;;  %151 = vmatpush.msra.mxu3 %v35_v29  ;;  %v19_v45 = vld [vmem:[%s415_s0 + $0x38] sm:$0xff]  ;;  %v16_v46 = vld [vmem:[%s415_s0 + $0x20] sm:$0xff]  ;;  %v17_v47 = vld [vmem:[%s415_s0 + $0x28] sm:$0xff]  ;;  %v172_v2 = vsel %vm171_vm2, %v225_v61, %v170_v1 }
  0x11   :  { %91 = vmatpush.msra.mxu0 %v32_v30  ;;  %111 = vmatpush.msra.mxu1 %v33_v31  ;;  %v14_v48 = vld [vmem:[%s415_s0 + $0x10] sm:$0xff]  ;;  %v15_v49 = vld [vmem:[%s415_s0 + $0x18] sm:$0xff]  ;;  %v11_v50 = vld [vmem:[%s416_s1] sm:$0xff] }
  0x12   :  { %132 = vmatpush.msra.mxu2 %v30_v32  ;;  %152 = vmatpush.msra.mxu3 %v31_v33  ;;  %v12_v51 = vld [vmem:[%s415_s0] sm:$0xff]  ;;  %v13_v52 = vld [vmem:[%s415_s0 + $0x8] sm:$0xff] }
  0x13   :  { %92 = vmatpush.msra.mxu0 %v28_v34  ;;  %112 = vmatpush.msra.mxu1 %v29_v35 }
  0x14   :  { %133 = vmatpush.msra.mxu2 %v26_v36  ;;  %153 = vmatpush.msra.mxu3 %v27_v37 }
  0x15   :  { %93 = vmatpush.msra.mxu0 %v24_v38  ;;  %113 = vmatpush.msra.mxu1 %v25_v39 }
  0x16   :  { %134 = vmatpush.msra.mxu2 %v22_v40  ;;  %154 = vmatpush.msra.mxu3 %v23_v41 }
  0x17   :  { %94 = vmatpush.msra.mxu0 %v20_v42  ;;  %114 = vmatpush.msra.mxu1 %v21_v43 }
  0x18   :  { %135 = vmatpush.msra.mxu2 %v18_v44  ;;  %155 = vmatpush.msra.mxu3 %v19_v45 }
  0x19   :  { %95 = vmatpush.msra.mxu0 %v16_v46  ;;  %115 = vmatpush.msra.mxu1 %v17_v47 }
  0x1a   :  { %136 = vmatpush.msra.mxu2 %v14_v48  ;;  %156 = vmatpush.msra.mxu3 %v15_v49 }
  0x1b   :  { %220 = vmatmul.msk.f32.vlgmr.msra.gmra.mxu2 %vm64_vm1, %v11_v50  ;;  %222 = vmatmul.msk.f32.vlgmr.msra.gmra.mxu3 %vm64_vm1, %v11_v50 }
  0x1c   :  { %96 = vmatpush.msra.mxu0 %v12_v51  ;;  %116 = vmatpush.msra.mxu1 %v13_v52 }
  0x1d   :  { %216 = vmatmul.msk.f32.vlgmr.msra.gmra.mxu0 %vm64_vm1, %v11_v50  ;;  %218 = vmatmul.msk.f32.vlgmr.msra.gmra.mxu1 %vm64_vm1, %v11_v50 }
  0x9a   :  { %v98_v53 = vpop.f32.mrf.mxu0  ;;  %v118_v54 = vpop.f32.mrf.mxu1 }
  0x9b   :  { %v161_v55 = vadd.f32 %v118_v54, %v98_v53 }
  0x9e   :  { %v138_v56 = vpop.f32.mrf.mxu2  ;;  %v158_v57 = vpop.f32.mrf.mxu3 }
  0x9f   :  { %v162_v58 = vadd.f32 %v161_v55, %v138_v56 }
  0xa1   :  { %v163_v59 = vadd.f32 %v162_v58, %v158_v57 }
  0xa3   :  { %164 = vadd.xlane.f32.xlu0 %v163_v59 }
 0x116   :  { %v165_v3 = vpop.xlane.xlu0 %164 }
 0x117   :  { %v173_v4 = vmul.f32 %v172_v2, %v165_v3 }
 0x119   :  { %v174_v5 = vsub.f32 %v98_v53, %v173_v4  ;;  %v175_v6 = vsub.f32 %v118_v54, %v173_v4  ;;  %v176_v7 = vsub.f32 %v138_v56, %v173_v4  ;;  %v177_v8 = vsub.f32 %v158_v57, %v173_v4 }
 0x11b   :  { %v178_v9 = vmul.f32 %v174_v5, %v174_v5  ;;  %v179_v10 = vmul.f32 %v175_v6, %v175_v6  ;;  %v180_v11 = vmul.f32 %v176_v7, %v176_v7  ;;  %v181_v13 = vmul.f32 %v177_v8, %v177_v8 }
 0x11d   :  { %v182_v12 = vadd.f32 %v179_v10, %v178_v9 }
 0x11f   :  { %v183_v14 = vadd.f32 %v182_v12, %v180_v11 }
 0x121   :  { %v184_v15 = vadd.f32 %v183_v14, %v181_v13 }
 0x123   :  { %185 = vadd.xlane.f32.xlu0 %v184_v15 }
 0x196   :  { %v186_v16 = vpop.xlane.xlu0 %185 }
 0x197   :  { %v187_v17 = vmul.f32 %v186_v16, %v172_v2 }
 0x199   :  { %v188_v18 = vadd.f32 1e-05, %v187_v17 }
 0x19b   :  { %226 = vrsqrt.f32 %v188_v18  ;;  %vm195_vm4 = vweird.f32 %v188_v18 }
 0x1a1   :  { %v227_v19 = vpop.eup %226 }
 0x1a2   :  { %v190_v20 = vmul.f32 %v227_v19, %v188_v18  ;;  %vm196_vm3 = vweird.f32 %v227_v19 }
 0x1a3   :  { %vm197_vm5 = vmor %vm195_vm4, %vm196_vm3 }
 0x1a4   :  { %v191_v21 = vmul.f32 %v227_v19, %v190_v20 }
 0x1a6   :  { %v192_v22 = vmul.f32 0.5, %v191_v21 }
 0x1a8   :  { %v193_v23 = vsub.f32 1.5, %v192_v22 }
 0x1aa   :  { %v194_v24 = vmul.f32 %v227_v19, %v193_v23 }
 0x1ac   :  { %v198_v25 = vsel %vm197_vm5, %v227_v19, %v194_v24 }
 0x1ad   :  { %v199_v26 = vmul.f32 %v198_v25, %v174_v5  ;;  %v200_v27 = vmul.f32 %v198_v25, %v175_v6  ;;  %v201_v28 = vmul.f32 %v198_v25, %v176_v7  ;;  %v202_v29 = vmul.f32 %v198_v25, %v177_v8 }
 0x1af   :  { %v203_v30 = vmax.f32 %v199_v26, 0.0  ;;  %v204_v31 = vmax.f32 %v200_v27, 0.0  ;;  %v205_v32 = vmax.f32 %v201_v28, 0.0  ;;  %v206_v33 = vmax.f32 %v202_v29, 0.0 }
 0x1b1   :  { %207 = vst [vmem:[%s417_s2] sm:$0xff] %v203_v30 }
 0x1b2   :  { %208 = vst [vmem:[%s417_s2 + $0x8] sm:$0xff] %v204_v31 }
 0x1b3   :  { %209 = vst [vmem:[%s417_s2 + $0x10] sm:$0xff] %v205_v32 }
 0x1b4   :  { %210 = vst [vmem:[%s417_s2 + $0x18] sm:$0xff] %v206_v33 }

// kernel: a_call__.10
= control target key start
LH: loop header
LB: loop body
LE: loop exit
PB: predicated region body
PF: predicated region fallthrough
CT: control target
= control target key end

     0   :  { %vm113_vm0 = vcmask 588800   ;;  %s684_s0 = inlined_call_operand.vmem [shape: f32[1,200,512], index: 0, kind: input, shape index: {}]   ;;  %s685_s1 = inlined_call_operand.vmem [shape: f32[1,8,200], index: 1, kind: input, shape index: {}]   ;;  %s686_s2 = inlined_call_operand.vmem [shape: f32[1,8,512], index: 2, kind: output, shape index: {}]  }
   0x1   :  { %v73_v0 = vld [vmem:[%s684_s0 + $0x1e0] sm:$0xff]  ;;  %v74_v5 = vld [vmem:[%s684_s0 + $0x1e8] sm:$0xff]  ;;  %v75_v34 = vld [vmem:[%s684_s0 + $0x1f0] sm:$0xff] }
   0x2   :  { %v69_v1 = vld [vmem:[%s684_s0 + $0x1c0] sm:$0xff]  ;;  %117 = vmatpush.msra.mxu0 %v73_v0  ;;  %157 = vmatpush.msra.mxu2 %v74_v5  ;;  %v70_v7 = vld [vmem:[%s684_s0 + $0x1c8] sm:$0xff]  ;;  %v71_v38 = vld [vmem:[%s684_s0 + $0x1d0] sm:$0xff] }
   0x3   :  { %v109_v2 = vld [vmem:[%s684_s0 + $0x300] sm:$0xff]  ;;  %v66_v9 = vld [vmem:[%s684_s0 + $0x1a8] sm:$0xff]  ;;  %v67_v42 = vld [vmem:[%s684_s0 + $0x1b0] sm:$0xff] }
   0x4   :  { %v65_v3 = vld [vmem:[%s684_s0 + $0x1a0] sm:$0xff]  ;;  %144 = vmatpush.msra.mxu1 %v109_v2  ;;  %118 = vmatpush.msra.mxu0 %v69_v1  ;;  %v110_v11 = vld [vmem:[%s684_s0 + $0x308] sm:$0xff]  ;;  %v111_v44 = vld [vmem:[%s684_s0 + $0x310] sm:$0xff] }
   0x5   :  { %v105_v4 = vld [vmem:[%s684_s0 + $0x2e0] sm:$0xff]  ;;  %158 = vmatpush.msra.mxu2 %v70_v7  ;;  %v62_v13 = vld [vmem:[%s684_s0 + $0x188] sm:$0xff]  ;;  %184 = vmatpush.msra.mxu3 %v110_v11  ;;  %v63_v46 = vld [vmem:[%s684_s0 + $0x190] sm:$0xff] }
   0x6   :  { %v101_v6 = vld [vmem:[%s684_s0 + $0x2c0] sm:$0xff]  ;;  %145 = vmatpush.msra.mxu1 %v105_v4  ;;  %119 = vmatpush.msra.mxu0 %v65_v3  ;;  %v106_v15 = vld [vmem:[%s684_s0 + $0x2e8] sm:$0xff]  ;;  %v107_v48 = vld [vmem:[%s684_s0 + $0x2f0] sm:$0xff] }
   0x7   :  { %v61_v8 = vld [vmem:[%s684_s0 + $0x180] sm:$0xff]  ;;  %159 = vmatpush.msra.mxu2 %v66_v9  ;;  %v58_v17 = vld [vmem:[%s684_s0 + $0x168] sm:$0xff]  ;;  %185 = vmatpush.msra.mxu3 %v106_v15  ;;  %v59_v50 = vld [vmem:[%s684_s0 + $0x170] sm:$0xff] }
   0x8   :  { %v97_v10 = vld [vmem:[%s684_s0 + $0x2a0] sm:$0xff]  ;;  %146 = vmatpush.msra.mxu1 %v101_v6  ;;  %120 = vmatpush.msra.mxu0 %v61_v8  ;;  %v102_v18 = vld [vmem:[%s684_s0 + $0x2c8] sm:$0xff]  ;;  %v103_v52 = vld [vmem:[%s684_s0 + $0x2d0] sm:$0xff] }
   0x9   :  { %v57_v12 = vld [vmem:[%s684_s0 + $0x160] sm:$0xff]  ;;  %160 = vmatpush.msra.mxu2 %v62_v13  ;;  %v98_v20 = vld [vmem:[%s684_s0 + $0x2a8] sm:$0xff]  ;;  %186 = vmatpush.msra.mxu3 %v102_v18  ;;  %v55_v54 = vld [vmem:[%s684_s0 + $0x150] sm:$0xff] }
   0xa   :  { %v93_v14 = vld [vmem:[%s684_s0 + $0x280] sm:$0xff]  ;;  %147 = vmatpush.msra.mxu1 %v97_v10  ;;  %121 = vmatpush.msra.mxu0 %v57_v12  ;;  %v54_v22 = vld [vmem:[%s684_s0 + $0x148] sm:$0xff]  ;;  %v99_v56 = vld [vmem:[%s684_s0 + $0x2b0] sm:$0xff] }
   0xb   :  { %v53_v16 = vld [vmem:[%s684_s0 + $0x140] sm:$0xff]  ;;  %161 = vmatpush.msra.mxu2 %v58_v17  ;;  %v94_v24 = vld [vmem:[%s684_s0 + $0x288] sm:$0xff]  ;;  %187 = vmatpush.msra.mxu3 %v98_v20  ;;  %v51_v58 = vld [vmem:[%s684_s0 + $0x130] sm:$0xff] }
   0xc   :  { %v89_v19 = vld [vmem:[%s684_s0 + $0x260] sm:$0xff]  ;;  %148 = vmatpush.msra.mxu1 %v93_v14  ;;  %122 = vmatpush.msra.mxu0 %v53_v16  ;;  %v50_v26 = vld [vmem:[%s684_s0 + $0x128] sm:$0xff]  ;;  %v76_v59 = vld [vmem:[%s684_s0 + $0x1f8] sm:$0xff] }
   0xd   :  { %v49_v21 = vld [vmem:[%s684_s0 + $0x120] sm:$0xff]  ;;  %162 = vmatpush.msra.mxu2 %v54_v22  ;;  %v90_v28 = vld [vmem:[%s684_s0 + $0x268] sm:$0xff]  ;;  %188 = vmatpush.msra.mxu3 %v94_v24  ;;  %v47_v61 = vld [vmem:[%s684_s0 + $0x110] sm:$0xff] }
   0xe   :  { %v85_v23 = vld [vmem:[%s684_s0 + $0x240] sm:$0xff]  ;;  %149 = vmatpush.msra.mxu1 %v89_v19  ;;  %123 = vmatpush.msra.mxu0 %v49_v21  ;;  %v46_v30 = vld [vmem:[%s684_s0 + $0x108] sm:$0xff]  ;;  %v95_v62 = vld [vmem:[%s684_s0 + $0x290] sm:$0xff] }
   0xf   :  { %v45_v25 = vld [vmem:[%s684_s0 + $0x100] sm:$0xff]  ;;  %163 = vmatpush.msra.mxu2 %v50_v26  ;;  %v86_v32 = vld [vmem:[%s684_s0 + $0x248] sm:$0xff]  ;;  %189 = vmatpush.msra.mxu3 %v90_v28  ;;  %v72_v63 = vld [vmem:[%s684_s0 + $0x1d8] sm:$0xff] }
  0x10   :  { %v81_v27 = vld [vmem:[%s684_s0 + $0x220] sm:$0xff]  ;;  %150 = vmatpush.msra.mxu1 %v85_v23  ;;  %124 = vmatpush.msra.mxu0 %v45_v25  ;;  %v42_v35 = vld [vmem:[%s684_s0 + $0xe8] sm:$0xff]  ;;  %v43_v1 = vld [vmem:[%s684_s0 + $0xf0] sm:$0xff] }
  0x11   :  { %v41_v29 = vld [vmem:[%s684_s0 + $0xe0] sm:$0xff]  ;;  %164 = vmatpush.msra.mxu2 %v46_v30  ;;  %v82_v36 = vld [vmem:[%s684_s0 + $0x228] sm:$0xff]  ;;  %190 = vmatpush.msra.mxu3 %v86_v32  ;;  %v112_v2 = vld [vmem:[%s684_s0 + $0x318] sm:$0xff] }
  0x12   :  { %v77_v31 = vld [vmem:[%s684_s0 + $0x200] sm:$0xff]  ;;  %151 = vmatpush.msra.mxu1 %v81_v27  ;;  %125 = vmatpush.msra.mxu0 %v41_v29  ;;  %v38_v39 = vld [vmem:[%s684_s0 + $0xc8] sm:$0xff]  ;;  %v68_v3 = vld [vmem:[%s684_s0 + $0x1b8] sm:$0xff] }
  0x13   :  { %v37_v33 = vld [vmem:[%s684_s0 + $0xc0] sm:$0xff]  ;;  %v78_v40 = vld [vmem:[%s684_s0 + $0x208] sm:$0xff]  ;;  %165 = vmatpush.msra.mxu2 %v42_v35  ;;  %191 = vmatpush.msra.mxu3 %v82_v36  ;;  %v39_v5 = vld [vmem:[%s684_s0 + $0xd0] sm:$0xff] }
  0x14   :  { %v33_v37 = vld [vmem:[%s684_s0 + $0xa0] sm:$0xff]  ;;  %152 = vmatpush.msra.mxu1 %v77_v31  ;;  %126 = vmatpush.msra.mxu0 %v37_v33  ;;  %v34_v43 = vld [vmem:[%s684_s0 + $0xa8] sm:$0xff]  ;;  %v91_v6 = vld [vmem:[%s684_s0 + $0x270] sm:$0xff] }
  0x15   :  { %v29_v41 = vld [vmem:[%s684_s0 + $0x80] sm:$0xff]  ;;  %166 = vmatpush.msra.mxu2 %v38_v39  ;;  %192 = vmatpush.msra.mxu3 %v78_v40  ;;  %v30_v47 = vld [vmem:[%s684_s0 + $0x88] sm:$0xff]  ;;  %v64_v7 = vld [vmem:[%s684_s0 + $0x198] sm:$0xff] }
  0x16   :  { %197 = vmatpush.msrb.mxu1 %v75_v34  ;;  %127 = vmatpush.msra.mxu0 %v33_v37  ;;  %v25_v45 = vld [vmem:[%s684_s0 + $0x60] sm:$0xff]  ;;  %v26_v51 = vld [vmem:[%s684_s0 + $0x68] sm:$0xff]  ;;  %v108_v8 = vld [vmem:[%s684_s0 + $0x2f8] sm:$0xff] }
  0x17   :  { %v21_v49 = vld [vmem:[%s684_s0 + $0x40] sm:$0xff]  ;;  %167 = vmatpush.msra.mxu2 %v34_v43  ;;  %224 = vmatpush.msrb.mxu3 %v111_v44  ;;  %v22_v55 = vld [vmem:[%s684_s0 + $0x48] sm:$0xff]  ;;  %v35_v9 = vld [vmem:[%s684_s0 + $0xb0] sm:$0xff] }
  0x18   :  { %198 = vmatpush.msrb.mxu1 %v71_v38  ;;  %128 = vmatpush.msra.mxu0 %v29_v41  ;;  %v17_v53 = vld [vmem:[%s684_s0 + $0x20] sm:$0xff]  ;;  %v18_v60 = vld [vmem:[%s684_s0 + $0x28] sm:$0xff]  ;;  %v87_v10 = vld [vmem:[%s684_s0 + $0x250] sm:$0xff] }
  0x19   :  { %168 = vmatpush.msra.mxu2 %v30_v47  ;;  %225 = vmatpush.msrb.mxu3 %v107_v48  ;;  %v13_v57 = vld [vmem:[%s684_s0] sm:$0xff]  ;;  %v14_v0 = vld [vmem:[%s684_s0 + $0x8] sm:$0xff]  ;;  %v60_v11 = vld [vmem:[%s684_s0 + $0x178] sm:$0xff] }
  0x1a   :  { %199 = vmatpush.msrb.mxu1 %v67_v42  ;;  %129 = vmatpush.msra.mxu0 %v25_v45  ;;  %v563_v4 = vld [vmem:[%s685_s1 + $0x8] sm:$0xff]  ;;  %v104_v12 = vld [vmem:[%s684_s0 + $0x2d8] sm:$0xff]  ;;  %v31_v13 = vld [vmem:[%s684_s0 + $0x90] sm:$0xff] }
  0x1b   :  { %169 = vmatpush.msra.mxu2 %v26_v51  ;;  %226 = vmatpush.msrb.mxu3 %v103_v52  ;;  %v83_v14 = vld [vmem:[%s684_s0 + $0x230] sm:$0xff]  ;;  %v56_v15 = vld [vmem:[%s684_s0 + $0x158] sm:$0xff]  ;;  %v11_v17 = vld [vmem:[%s685_s1] sm:$0xff] }
  0x1c   :  { %200 = vmatpush.msrb.mxu1 %v63_v46  ;;  %130 = vmatpush.msra.mxu0 %v21_v49  ;;  %v100_v16 = vld [vmem:[%s684_s0 + $0x2b8] sm:$0xff]  ;;  %v27_v19 = vld [vmem:[%s684_s0 + $0x70] sm:$0xff] }
  0x1d   :  { %170 = vmatpush.msra.mxu2 %v22_v55  ;;  %227 = vmatpush.msrb.mxu3 %v99_v56  ;;  %v52_v18 = vld [vmem:[%s684_s0 + $0x138] sm:$0xff]  ;;  %v79_v20 = vld [vmem:[%s684_s0 + $0x210] sm:$0xff] }
  0x1e   :  { %201 = vmatpush.msrb.mxu1 %v59_v50  ;;  %131 = vmatpush.msra.mxu0 %v17_v53  ;;  %v96_v21 = vld [vmem:[%s684_s0 + $0x298] sm:$0xff]  ;;  %v23_v23 = vld [vmem:[%s684_s0 + $0x50] sm:$0xff]  ;;  %v340_v53 = vmov 512.0  }
  0x1f   :  { %171 = vmatpush.msra.mxu2 %v18_v60  ;;  %228 = vmatpush.msrb.mxu3 %v95_v62  ;;  %v48_v22 = vld [vmem:[%s684_s0 + $0x118] sm:$0xff]  ;;  %v19_v26 = vld [vmem:[%s684_s0 + $0x30] sm:$0xff]  ;;  %336 = vrcp.f32 %v340_v53 }
  0x20   :  { %202 = vmatpush.msrb.mxu1 %v55_v54  ;;  %132 = vmatpush.msra.mxu0 %v13_v57  ;;  %v92_v24 = vld [vmem:[%s684_s0 + $0x278] sm:$0xff]  ;;  %v15_v29 = vld [vmem:[%s684_s0 + $0x10] sm:$0xff] }
  0x21   :  { %172 = vmatpush.msra.mxu2 %v14_v0  ;;  %332 = vmatmul.msk.f32.vlgmr.msra.gmra.mxu3 %vm113_vm0, %v563_v4  ;;  %v44_v25 = vld [vmem:[%s684_s0 + $0xf8] sm:$0xff] }
  0x22   :  { %203 = vmatpush.msrb.mxu1 %v51_v58  ;;  %237 = vmatpush.msrb.mxu0 %v76_v59  ;;  %v88_v27 = vld [vmem:[%s684_s0 + $0x258] sm:$0xff] }
  0x23   :  { %264 = vmatpush.msrb.mxu2 %v112_v2  ;;  %229 = vmatpush.msrb.mxu3 %v91_v6  ;;  %v40_v28 = vld [vmem:[%s684_s0 + $0xd8] sm:$0xff] }
  0x24   :  { %204 = vmatpush.msrb.mxu1 %v47_v61  ;;  %238 = vmatpush.msrb.mxu0 %v72_v63  ;;  %v36_v30 = vld [vmem:[%s684_s0 + $0xb8] sm:$0xff] }
  0x25   :  { %265 = vmatpush.msrb.mxu2 %v108_v8  ;;  %230 = vmatpush.msrb.mxu3 %v87_v10  ;;  %v84_v31 = vld [vmem:[%s684_s0 + $0x238] sm:$0xff]  ;;  %v337_v54 = vpop.eup %336 }
  0x26   :  { %205 = vmatpush.msrb.mxu1 %v43_v1  ;;  %239 = vmatpush.msrb.mxu0 %v68_v3  ;;  %v32_v32 = vld [vmem:[%s684_s0 + $0x98] sm:$0xff]  ;;  %v283_v55 = vmul.f32 512.0, %v337_v54  ;;  %vm287_vm1 = vweird.f32 %v337_v54 }
  0x27   :  { %266 = vmatpush.msrb.mxu2 %v104_v12  ;;  %231 = vmatpush.msrb.mxu3 %v83_v14  ;;  %v80_v33 = vld [vmem:[%s684_s0 + $0x218] sm:$0xff] }
  0x28   :  { %206 = vmatpush.msrb.mxu1 %v39_v5  ;;  %240 = vmatpush.msrb.mxu0 %v64_v7  ;;  %v28_v34 = vld [vmem:[%s684_s0 + $0x78] sm:$0xff]  ;;  %v284_v56 = vsub.f32 1.0, %v283_v55 }
  0x29   :  { %267 = vmatpush.msrb.mxu2 %v100_v16  ;;  %331 = vmatmul.msk.f32.vlgmr.msra.gmra.mxu1 %vm113_vm0, %v563_v4  ;;  %v24_v35 = vld [vmem:[%s684_s0 + $0x58] sm:$0xff] }
  0x2a   :  { %207 = vmatpush.msrb.mxu1 %v35_v9  ;;  %241 = vmatpush.msrb.mxu0 %v60_v11  ;;  %v20_v36 = vld [vmem:[%s684_s0 + $0x38] sm:$0xff]  ;;  %v285_v57 = vmul.f32 %v337_v54, %v284_v56 }
  0x2b   :  { %173 = vmatmul.f32.vlgmr.msra.gmra.mxu2 %v11_v17  ;;  %232 = vmatpush.msrb.mxu3 %v79_v20  ;;  %v16_v37 = vld [vmem:[%s684_s0 + $0x18] sm:$0xff] }
  0x2c   :  { %208 = vmatpush.msrb.mxu1 %v31_v13  ;;  %242 = vmatpush.msrb.mxu0 %v56_v15  ;;  %v286_v58 = vadd.f32 %v337_v54, %v285_v57 }
  0x2d   :  { %268 = vmatpush.msrb.mxu2 %v96_v21  ;;  %333 = vmatmul.msk.f32.vlgmr.msrb.gmra.mxu3 %vm113_vm0, %v563_v4 }
  0x2e   :  { %243 = vmatpush.msrb.mxu0 %v52_v18  ;;  %209 = vmatpush.msrb.mxu1 %v27_v19  ;;  %v288_v59 = vsel %vm287_vm1, %v337_v54, %v286_v58 }
  0x2f   :  { %269 = vmatpush.msrb.mxu2 %v92_v24  ;;  %133 = vmatmul.f32.vlgmr.msra.gmra.mxu0 %v11_v17 }
  0x30   :  { %244 = vmatpush.msrb.mxu0 %v48_v22  ;;  %210 = vmatpush.msrb.mxu1 %v23_v23 }
  0x31   :  { %270 = vmatpush.msrb.mxu2 %v88_v27 }
  0x32   :  { %245 = vmatpush.msrb.mxu0 %v44_v25  ;;  %211 = vmatpush.msrb.mxu1 %v19_v26 }
  0x33   :  { %271 = vmatpush.msrb.mxu2 %v84_v31 }
  0x34   :  { %246 = vmatpush.msrb.mxu0 %v40_v28  ;;  %212 = vmatpush.msrb.mxu1 %v15_v29 }
  0x35   :  { %213 = vmatmul.f32.vlgmr.msrb.gmra.mxu1 %v11_v17  ;;  %272 = vmatpush.msrb.mxu2 %v80_v33 }
  0x36   :  { %247 = vmatpush.msrb.mxu0 %v36_v30  ;;  %334 = vmatmul.msk.f32.vlgmr.msrb.gmra.mxu2 %vm113_vm0, %v563_v4 }
  0x38   :  { %248 = vmatpush.msrb.mxu0 %v32_v32 }
  0x3a   :  { %249 = vmatpush.msrb.mxu0 %v28_v34 }
  0x3c   :  { %250 = vmatpush.msrb.mxu0 %v24_v35 }
  0x3e   :  { %251 = vmatpush.msrb.mxu0 %v20_v36 }
  0x40   :  { %252 = vmatpush.msrb.mxu0 %v16_v37 }
  0x41   :  { %253 = vmatmul.f32.vlgmr.msrb.gmra.mxu0 %v11_v17 }
  0xa4   :  { %v194_v39 = vpop.f32.mrf.mxu3 }
  0xa6   :  { %v154_v38 = vpop.f32.mrf.mxu1 }
  0xac   :  { %v134_v40 = vpop.f32.mrf.mxu0 }
  0xad   :  { %v155_v42 = vadd.f32 %v154_v38, %v134_v40 }
  0xae   :  { %v174_v41 = vpop.f32.mrf.mxu2 }
  0xaf   :  { %v195_v43 = vadd.f32 %v194_v39, %v174_v41 }
  0xb0   :  { %v234_v45 = vpop.f32.mrf.mxu3 }
  0xb1   :  { %v277_v46 = vadd.f32 %v195_v43, %v155_v42 }
  0xb2   :  { %v214_v44 = vpop.f32.mrf.mxu1 }
  0xb3   :  { %v235_v47 = vadd.f32 %v234_v45, %v214_v44 }
  0xb5   :  { %v278_v51 = vadd.f32 %v277_v46, %v235_v47 }
  0xb9   :  { %v274_v48 = vpop.f32.mrf.mxu2 }
  0xbe   :  { %v254_v49 = vpop.f32.mrf.mxu0 }
  0xbf   :  { %v275_v50 = vadd.f32 %v274_v48, %v254_v49 }
  0xc1   :  { %v279_v52 = vadd.f32 %v278_v51, %v275_v50 }
  0xc3   :  { %280 = vadd.xlane.f32.xlu0 %v279_v52 }
 0x136   :  { %v281_v60 = vpop.xlane.xlu0 %280 }
 0x137   :  { %v289_v61 = vmul.f32 %v288_v59, %v281_v60 }
 0x139   :  { %v290_v62 = vsub.f32 %v155_v42, %v289_v61  ;;  %v291_v63 = vsub.f32 %v195_v43, %v289_v61  ;;  %v292_v0 = vsub.f32 %v235_v47, %v289_v61  ;;  %v293_v1 = vsub.f32 %v275_v50, %v289_v61 }
 0x13b   :  { %v294_v2 = vmul.f32 %v290_v62, %v290_v62  ;;  %v295_v3 = vmul.f32 %v291_v63, %v291_v63  ;;  %v296_v4 = vmul.f32 %v292_v0, %v292_v0  ;;  %v297_v6 = vmul.f32 %v293_v1, %v293_v1 }
 0x13d   :  { %v298_v5 = vadd.f32 %v295_v3, %v294_v2 }
 0x13f   :  { %v299_v7 = vadd.f32 %v298_v5, %v296_v4 }
 0x141   :  { %v300_v8 = vadd.f32 %v299_v7, %v297_v6 }
 0x143   :  { %301 = vadd.xlane.f32.xlu0 %v300_v8 }
 0x1b6   :  { %v302_v9 = vpop.xlane.xlu0 %301 }
 0x1b7   :  { %v303_v10 = vmul.f32 %v302_v9, %v288_v59 }
 0x1b9   :  { %v304_v11 = vadd.f32 1e-05, %v303_v10 }
 0x1bb   :  { %338 = vrsqrt.f32 %v304_v11  ;;  %vm311_vm3 = vweird.f32 %v304_v11 }
 0x1c1   :  { %v339_v12 = vpop.eup %338 }
 0x1c2   :  { %v306_v13 = vmul.f32 %v339_v12, %v304_v11  ;;  %vm312_vm2 = vweird.f32 %v339_v12 }
 0x1c3   :  { %vm313_vm4 = vmor %vm311_vm3, %vm312_vm2 }
 0x1c4   :  { %v307_v14 = vmul.f32 %v339_v12, %v306_v13 }
 0x1c6   :  { %v308_v15 = vmul.f32 0.5, %v307_v14 }
 0x1c8   :  { %v309_v16 = vsub.f32 1.5, %v308_v15 }
 0x1ca   :  { %v310_v17 = vmul.f32 %v339_v12, %v309_v16 }
 0x1cc   :  { %v314_v18 = vsel %vm313_vm4, %v339_v12, %v310_v17 }
 0x1cd   :  { %v315_v19 = vmul.f32 %v314_v18, %v290_v62  ;;  %v316_v20 = vmul.f32 %v314_v18, %v291_v63  ;;  %v317_v21 = vmul.f32 %v314_v18, %v292_v0  ;;  %v318_v22 = vmul.f32 %v314_v18, %v293_v1 }
 0x1cf   :  { %v319_v23 = vmax.f32 %v315_v19, 0.0  ;;  %v320_v24 = vmax.f32 %v316_v20, 0.0  ;;  %v321_v25 = vmax.f32 %v317_v21, 0.0  ;;  %v322_v26 = vmax.f32 %v318_v22, 0.0 }
 0x1d1   :  { %323 = vst [vmem:[%s686_s2] sm:$0xff] %v319_v23 }
 0x1d2   :  { %324 = vst [vmem:[%s686_s2 + $0x8] sm:$0xff] %v320_v24 }
 0x1d3   :  { %325 = vst [vmem:[%s686_s2 + $0x10] sm:$0xff] %v321_v25 }
 0x1d4   :  { %326 = vst [vmem:[%s686_s2 + $0x18] sm:$0xff] %v322_v26 }

// kernel: a_call__.11
= control target key start
LH: loop header
LB: loop body
LE: loop exit
PB: predicated region body
PF: predicated region fallthrough
CT: control target
= control target key end

     0   :  { %vm134_vm0 = vcmask 719872   ;;  %vm303_vm1 = vcmask 1043456   ;;  %s687_s0 = inlined_call_operand.vmem [shape: f32[1,216,512], index: 0, kind: input, shape index: {}]   ;;  %s688_s1 = inlined_call_operand.vmem [shape: f32[1,4,216], index: 1, kind: input, shape index: {}]   ;;  %s689_s2 = inlined_call_operand.vmem [shape: f32[1,4,1], index: 2, kind: input, shape index: {}]   ;;  %s690_s3 = inlined_call_operand.vmem [shape: f32[1,4,512], index: 3, kind: output, shape index: {}]  }
   0x1   :  { %v75_v0 = vld [vmem:[%s687_s0 + $0x1e0] sm:$0xff]  ;;  %v76_v2 = vld [vmem:[%s687_s0 + $0x1e8] sm:$0xff]  ;;  %v77_v43 = vld [vmem:[%s687_s0 + $0x1f0] sm:$0xff] }
   0x2   :  { %v71_v1 = vld [vmem:[%s687_s0 + $0x1c0] sm:$0xff]  ;;  %137 = vmatpush.msra.mxu0 %v75_v0  ;;  %177 = vmatpush.msra.mxu2 %v76_v2  ;;  %v72_v4 = vld [vmem:[%s687_s0 + $0x1c8] sm:$0xff]  ;;  %v73_v47 = vld [vmem:[%s687_s0 + $0x1d0] sm:$0xff] }
   0x3   :  { %v67_v3 = vld [vmem:[%s687_s0 + $0x1a0] sm:$0xff]  ;;  %v68_v6 = vld [vmem:[%s687_s0 + $0x1a8] sm:$0xff]  ;;  %v69_v51 = vld [vmem:[%s687_s0 + $0x1b0] sm:$0xff] }
   0x4   :  { %v119_v5 = vld [vmem:[%s687_s0 + $0x340] sm:$0xff]  ;;  %138 = vmatpush.msra.mxu0 %v71_v1  ;;  %178 = vmatpush.msra.mxu2 %v72_v4  ;;  %v64_v10 = vld [vmem:[%s687_s0 + $0x188] sm:$0xff]  ;;  %v65_v56 = vld [vmem:[%s687_s0 + $0x190] sm:$0xff] }
   0x5   :  { %162 = vmatpush.msra.mxu1 %v119_v5  ;;  %v115_v7 = vld [vmem:[%s687_s0 + $0x320] sm:$0xff]  ;;  %v120_v13 = vld [vmem:[%s687_s0 + $0x348] sm:$0xff]  ;;  %v121_v58 = vld [vmem:[%s687_s0 + $0x350] sm:$0xff] }
   0x6   :  { %v63_v8 = vld [vmem:[%s687_s0 + $0x180] sm:$0xff]  ;;  %139 = vmatpush.msra.mxu0 %v67_v3  ;;  %179 = vmatpush.msra.mxu2 %v68_v6  ;;  %v60_v14 = vld [vmem:[%s687_s0 + $0x168] sm:$0xff]  ;;  %v78_v59 = vld [vmem:[%s687_s0 + $0x1f8] sm:$0xff] }
   0x7   :  { %v111_v9 = vld [vmem:[%s687_s0 + $0x300] sm:$0xff]  ;;  %163 = vmatpush.msra.mxu1 %v115_v7  ;;  %v116_v15 = vld [vmem:[%s687_s0 + $0x328] sm:$0xff]  ;;  %202 = vmatpush.msra.mxu3 %v120_v13  ;;  %v122_v61 = vld [vmem:[%s687_s0 + $0x358] sm:$0xff] }
   0x8   :  { %v59_v11 = vld [vmem:[%s687_s0 + $0x160] sm:$0xff]  ;;  %140 = vmatpush.msra.mxu0 %v63_v8  ;;  %180 = vmatpush.msra.mxu2 %v64_v10  ;;  %v56_v18 = vld [vmem:[%s687_s0 + $0x148] sm:$0xff]  ;;  %v61_v62 = vld [vmem:[%s687_s0 + $0x170] sm:$0xff] }
   0x9   :  { %v107_v12 = vld [vmem:[%s687_s0 + $0x2e0] sm:$0xff]  ;;  %164 = vmatpush.msra.mxu1 %v111_v9  ;;  %v112_v19 = vld [vmem:[%s687_s0 + $0x308] sm:$0xff]  ;;  %203 = vmatpush.msra.mxu3 %v116_v15  ;;  %v74_v63 = vld [vmem:[%s687_s0 + $0x1d8] sm:$0xff] }
   0xa   :  { %v55_v16 = vld [vmem:[%s687_s0 + $0x140] sm:$0xff]  ;;  %141 = vmatpush.msra.mxu0 %v59_v11  ;;  %181 = vmatpush.msra.mxu2 %v60_v14  ;;  %v52_v22 = vld [vmem:[%s687_s0 + $0x128] sm:$0xff]  ;;  %v117_v0 = vld [vmem:[%s687_s0 + $0x330] sm:$0xff] }
   0xb   :  { %v103_v17 = vld [vmem:[%s687_s0 + $0x2c0] sm:$0xff]  ;;  %165 = vmatpush.msra.mxu1 %v107_v12  ;;  %v108_v23 = vld [vmem:[%s687_s0 + $0x2e8] sm:$0xff]  ;;  %204 = vmatpush.msra.mxu3 %v112_v19  ;;  %v118_v1 = vld [vmem:[%s687_s0 + $0x338] sm:$0xff] }
   0xc   :  { %v51_v20 = vld [vmem:[%s687_s0 + $0x120] sm:$0xff]  ;;  %142 = vmatpush.msra.mxu0 %v55_v16  ;;  %182 = vmatpush.msra.mxu2 %v56_v18  ;;  %v48_v26 = vld [vmem:[%s687_s0 + $0x108] sm:$0xff]  ;;  %v57_v2 = vld [vmem:[%s687_s0 + $0x150] sm:$0xff] }
   0xd   :  { %v99_v21 = vld [vmem:[%s687_s0 + $0x2a0] sm:$0xff]  ;;  %166 = vmatpush.msra.mxu1 %v103_v17  ;;  %v104_v27 = vld [vmem:[%s687_s0 + $0x2c8] sm:$0xff]  ;;  %205 = vmatpush.msra.mxu3 %v108_v23  ;;  %v70_v3 = vld [vmem:[%s687_s0 + $0x1b8] sm:$0xff] }
   0xe   :  { %v47_v24 = vld [vmem:[%s687_s0 + $0x100] sm:$0xff]  ;;  %143 = vmatpush.msra.mxu0 %v51_v20  ;;  %183 = vmatpush.msra.mxu2 %v52_v22  ;;  %v44_v30 = vld [vmem:[%s687_s0 + $0xe8] sm:$0xff]  ;;  %v113_v4 = vld [vmem:[%s687_s0 + $0x310] sm:$0xff] }
   0xf   :  { %v95_v25 = vld [vmem:[%s687_s0 + $0x280] sm:$0xff]  ;;  %167 = vmatpush.msra.mxu1 %v99_v21  ;;  %v100_v31 = vld [vmem:[%s687_s0 + $0x2a8] sm:$0xff]  ;;  %206 = vmatpush.msra.mxu3 %v104_v27  ;;  %v114_v5 = vld [vmem:[%s687_s0 + $0x318] sm:$0xff] }
  0x10   :  { %v43_v28 = vld [vmem:[%s687_s0 + $0xe0] sm:$0xff]  ;;  %144 = vmatpush.msra.mxu0 %v47_v24  ;;  %184 = vmatpush.msra.mxu2 %v48_v26  ;;  %v40_v34 = vld [vmem:[%s687_s0 + $0xc8] sm:$0xff]  ;;  %v53_v6 = vld [vmem:[%s687_s0 + $0x130] sm:$0xff] }
  0x11   :  { %v91_v29 = vld [vmem:[%s687_s0 + $0x260] sm:$0xff]  ;;  %168 = vmatpush.msra.mxu1 %v95_v25  ;;  %v96_v35 = vld [vmem:[%s687_s0 + $0x288] sm:$0xff]  ;;  %207 = vmatpush.msra.mxu3 %v100_v31  ;;  %v66_v7 = vld [vmem:[%s687_s0 + $0x198] sm:$0xff] }
  0x12   :  { %v39_v32 = vld [vmem:[%s687_s0 + $0xc0] sm:$0xff]  ;;  %145 = vmatpush.msra.mxu0 %v43_v28  ;;  %185 = vmatpush.msra.mxu2 %v44_v30  ;;  %v36_v38 = vld [vmem:[%s687_s0 + $0xa8] sm:$0xff]  ;;  %v109_v8 = vld [vmem:[%s687_s0 + $0x2f0] sm:$0xff] }
  0x13   :  { %v87_v33 = vld [vmem:[%s687_s0 + $0x240] sm:$0xff]  ;;  %169 = vmatpush.msra.mxu1 %v91_v29  ;;  %v92_v39 = vld [vmem:[%s687_s0 + $0x268] sm:$0xff]  ;;  %208 = vmatpush.msra.mxu3 %v96_v35  ;;  %v110_v9 = vld [vmem:[%s687_s0 + $0x2f8] sm:$0xff] }
  0x14   :  { %v35_v36 = vld [vmem:[%s687_s0 + $0xa0] sm:$0xff]  ;;  %146 = vmatpush.msra.mxu0 %v39_v32  ;;  %186 = vmatpush.msra.mxu2 %v40_v34  ;;  %v32_v42 = vld [vmem:[%s687_s0 + $0x88] sm:$0xff]  ;;  %v49_v10 = vld [vmem:[%s687_s0 + $0x110] sm:$0xff] }
  0x15   :  { %v83_v37 = vld [vmem:[%s687_s0 + $0x220] sm:$0xff]  ;;  %170 = vmatpush.msra.mxu1 %v87_v33  ;;  %209 = vmatpush.msra.mxu3 %v92_v39  ;;  %v88_v45 = vld [vmem:[%s687_s0 + $0x248] sm:$0xff]  ;;  %v62_v11 = vld [vmem:[%s687_s0 + $0x178] sm:$0xff] }
  0x16   :  { %v31_v40 = vld [vmem:[%s687_s0 + $0x80] sm:$0xff]  ;;  %147 = vmatpush.msra.mxu0 %v35_v36  ;;  %187 = vmatpush.msra.mxu2 %v36_v38  ;;  %v28_v46 = vld [vmem:[%s687_s0 + $0x68] sm:$0xff]  ;;  %v105_v12 = vld [vmem:[%s687_s0 + $0x2d0] sm:$0xff] }
  0x17   :  { %v79_v41 = vld [vmem:[%s687_s0 + $0x200] sm:$0xff]  ;;  %171 = vmatpush.msra.mxu1 %v83_v37  ;;  %v84_v49 = vld [vmem:[%s687_s0 + $0x228] sm:$0xff]  ;;  %210 = vmatpush.msra.mxu3 %v88_v45  ;;  %v106_v13 = vld [vmem:[%s687_s0 + $0x2d8] sm:$0xff] }
  0x18   :  { %v27_v44 = vld [vmem:[%s687_s0 + $0x60] sm:$0xff]  ;;  %148 = vmatpush.msra.mxu0 %v31_v40  ;;  %188 = vmatpush.msra.mxu2 %v32_v42  ;;  %v24_v50 = vld [vmem:[%s687_s0 + $0x48] sm:$0xff]  ;;  %v45_v14 = vld [vmem:[%s687_s0 + $0xf0] sm:$0xff] }
  0x19   :  { %172 = vmatpush.msra.mxu1 %v79_v41  ;;  %v23_v48 = vld [vmem:[%s687_s0 + $0x40] sm:$0xff]  ;;  %v80_v53 = vld [vmem:[%s687_s0 + $0x208] sm:$0xff]  ;;  %211 = vmatpush.msra.mxu3 %v84_v49  ;;  %v58_v15 = vld [vmem:[%s687_s0 + $0x158] sm:$0xff] }
  0x1a   :  { %149 = vmatpush.msra.mxu0 %v27_v44  ;;  %v19_v52 = vld [vmem:[%s687_s0 + $0x20] sm:$0xff]  ;;  %189 = vmatpush.msra.mxu2 %v28_v46  ;;  %v20_v55 = vld [vmem:[%s687_s0 + $0x28] sm:$0xff]  ;;  %v101_v17 = vld [vmem:[%s687_s0 + $0x2b0] sm:$0xff] }
  0x1b   :  { %217 = vmatpush.msrb.mxu1 %v77_v43  ;;  %v14_v54 = vld [vmem:[%s688_s1] sm:$0xff]  ;;  %v16_v60 = vld [vmem:[%s687_s0 + $0x8] sm:$0xff]  ;;  %212 = vmatpush.msra.mxu3 %v80_v53  ;;  %v102_v18 = vld [vmem:[%s687_s0 + $0x2b8] sm:$0xff] }
  0x1c   :  { %150 = vmatpush.msra.mxu0 %v23_v48  ;;  %130 = vst [vmem:[#allocation1] ss:$2 sm:$0xff] %v14_v54  ;;  %v15_v57 = vld [vmem:[%s687_s0] sm:$0xff]  ;;  %190 = vmatpush.msra.mxu2 %v24_v50  ;;  %v54_v19 = vld [vmem:[%s687_s0 + $0x138] sm:$0xff]  ;;  %v41_v21 = vld [vmem:[%s687_s0 + $0xd0] sm:$0xff] }
  0x1d   :  { %218 = vmatpush.msrb.mxu1 %v73_v47  ;;  %242 = vmatpush.msrb.mxu3 %v121_v58  ;;  %v97_v22 = vld [vmem:[%s687_s0 + $0x290] sm:$0xff]  ;;  %v50_v23 = vld [vmem:[%s687_s0 + $0x118] sm:$0xff]  ;;  %v123_v45 = vld [vmem:[%s689_s2] sm:$0xf]  ;;  %v320_v47 = vmov 0  }
  0x1e   :  { %151 = vmatpush.msra.mxu0 %v19_v52  ;;  %191 = vmatpush.msra.mxu2 %v20_v55  ;;  %v98_v24 = vld [vmem:[%s687_s0 + $0x298] sm:$0xff]  ;;  %v37_v25 = vld [vmem:[%s687_s0 + $0xb0] sm:$0xff] }
  0x1f   :  { %219 = vmatpush.msrb.mxu1 %v69_v51  ;;  %243 = vmatpush.msrb.mxu3 %v117_v0  ;;  %v93_v26 = vld [vmem:[%s687_s0 + $0x270] sm:$0xff]  ;;  %v46_v27 = vld [vmem:[%s687_s0 + $0xf8] sm:$0xff] }
  0x20   :  { %152 = vmatpush.msra.mxu0 %v15_v57  ;;  %192 = vmatpush.msra.mxu2 %v16_v60  ;;  %v94_v28 = vld [vmem:[%s687_s0 + $0x278] sm:$0xff]  ;;  %v33_v29 = vld [vmem:[%s687_s0 + $0x90] sm:$0xff] }
  0x21   :  { %220 = vmatpush.msrb.mxu1 %v65_v56  ;;  %244 = vmatpush.msrb.mxu3 %v113_v4  ;;  %v89_v30 = vld [vmem:[%s687_s0 + $0x250] sm:$0xff]  ;;  %v42_v31 = vld [vmem:[%s687_s0 + $0xd8] sm:$0xff] }
  0x22   :  { %257 = vmatpush.msrb.mxu0 %v78_v59  ;;  %282 = vmatpush.msrb.mxu2 %v122_v61  ;;  %v90_v32 = vld [vmem:[%s687_s0 + $0x258] sm:$0xff]  ;;  %v29_v34 = vld [vmem:[%s687_s0 + $0x70] sm:$0xff] }
  0x23   :  { %221 = vmatpush.msrb.mxu1 %v61_v62  ;;  %245 = vmatpush.msrb.mxu3 %v109_v8  ;;  %v581_v16 = vld.sshfl [vmem:[#allocation1] sm:$0xff pattern:$0x75316420]  ;;  %v132_v20 = vld.sshfl [vmem:[#allocation1 + $0x8] sm:$0xff pattern:$0x75316420] }
  0x24   :  { %258 = vmatpush.msrb.mxu0 %v74_v63  ;;  %283 = vmatpush.msrb.mxu2 %v118_v1  ;;  %v38_v33 = vld [vmem:[%s687_s0 + $0xb8] sm:$0xff]  ;;  %v85_v35 = vld [vmem:[%s687_s0 + $0x230] sm:$0xff] }
  0x25   :  { %222 = vmatpush.msrb.mxu1 %v57_v2  ;;  %246 = vmatpush.msrb.mxu3 %v105_v12  ;;  %v86_v36 = vld [vmem:[%s687_s0 + $0x238] sm:$0xff]  ;;  %v25_v38 = vld [vmem:[%s687_s0 + $0x50] sm:$0xff] }
  0x26   :  { %259 = vmatpush.msrb.mxu0 %v70_v3  ;;  %284 = vmatpush.msrb.mxu2 %v114_v5  ;;  %v34_v37 = vld [vmem:[%s687_s0 + $0x98] sm:$0xff]  ;;  %v81_v39 = vld [vmem:[%s687_s0 + $0x210] sm:$0xff] }
  0x27   :  { %223 = vmatpush.msrb.mxu1 %v53_v6  ;;  %193 = vmatmul.f32.vlgmr.msra.gmra.mxu2 %v581_v16  ;;  %v82_v40 = vld [vmem:[%s687_s0 + $0x218] sm:$0xff]  ;;  %v21_v42 = vld [vmem:[%s687_s0 + $0x30] sm:$0xff] }
  0x28   :  { %260 = vmatpush.msrb.mxu0 %v66_v7  ;;  %285 = vmatpush.msrb.mxu2 %v110_v9  ;;  %v30_v41 = vld [vmem:[%s687_s0 + $0x78] sm:$0xff]  ;;  %v17_v44 = vld [vmem:[%s687_s0 + $0x10] sm:$0xff] }
  0x29   :  { %224 = vmatpush.msrb.mxu1 %v49_v10  ;;  %247 = vmatpush.msrb.mxu3 %v101_v17  ;;  %v26_v43 = vld [vmem:[%s687_s0 + $0x58] sm:$0xff] }
  0x2a   :  { %261 = vmatpush.msrb.mxu0 %v62_v11  ;;  %286 = vmatpush.msrb.mxu2 %v106_v13  ;;  %v22_v46 = vld [vmem:[%s687_s0 + $0x38] sm:$0xff] }
  0x2b   :  { %225 = vmatpush.msrb.mxu1 %v45_v14  ;;  %315 = vmatmul.msk.f32.vlgmr.msra.gmra.mxu3 %vm134_vm0, %v132_v20  ;;  %v18_v48 = vld [vmem:[%s687_s0 + $0x18] sm:$0xff] }
  0x2c   :  { %262 = vmatpush.msrb.mxu0 %v58_v15  ;;  %287 = vmatpush.msrb.mxu2 %v102_v18 }
  0x2d   :  { %226 = vmatpush.msrb.mxu1 %v41_v21  ;;  %248 = vmatpush.msrb.mxu3 %v97_v22 }
  0x2e   :  { %263 = vmatpush.msrb.mxu0 %v54_v19  ;;  %288 = vmatpush.msrb.mxu2 %v98_v24 }
  0x2f   :  { %227 = vmatpush.msrb.mxu1 %v37_v25  ;;  %249 = vmatpush.msrb.mxu3 %v93_v26 }
  0x30   :  { %264 = vmatpush.msrb.mxu0 %v50_v23  ;;  %289 = vmatpush.msrb.mxu2 %v94_v28 }
  0x31   :  { %228 = vmatpush.msrb.mxu1 %v33_v29  ;;  %250 = vmatpush.msrb.mxu3 %v89_v30 }
  0x32   :  { %265 = vmatpush.msrb.mxu0 %v46_v27  ;;  %290 = vmatpush.msrb.mxu2 %v90_v32 }
  0x33   :  { %153 = vmatmul.f32.vlgmr.msra.gmra.mxu0 %v581_v16  ;;  %314 = vmatmul.msk.f32.vlgmr.msra.gmra.mxu1 %vm134_vm0, %v132_v20 }
  0x34   :  { %266 = vmatpush.msrb.mxu0 %v42_v31  ;;  %229 = vmatpush.msrb.mxu1 %v29_v34 }
  0x35   :  { %251 = vmatpush.msrb.mxu3 %v85_v35  ;;  %291 = vmatpush.msrb.mxu2 %v86_v36 }
  0x36   :  { %267 = vmatpush.msrb.mxu0 %v38_v33  ;;  %230 = vmatpush.msrb.mxu1 %v25_v38 }
  0x37   :  { %252 = vmatpush.msrb.mxu3 %v81_v39  ;;  %292 = vmatpush.msrb.mxu2 %v82_v40 }
  0x38   :  { %268 = vmatpush.msrb.mxu0 %v34_v37  ;;  %316 = vmatmul.msk.f32.vlgmr.msrb.gmra.mxu3 %vm134_vm0, %v132_v20 }
  0x39   :  { %317 = vmatmul.msk.f32.vlgmr.msrb.gmra.mxu2 %vm134_vm0, %v132_v20  ;;  %231 = vmatpush.msrb.mxu1 %v21_v42 }
  0x3a   :  { %269 = vmatpush.msrb.mxu0 %v30_v41  ;;  %319 = vset.pattern.permute.xlu0 %v320_v47 }
  0x3b   :  { %232 = vmatpush.msrb.mxu1 %v17_v44  ;;  %126 = vperm.xlu0 %319, %v123_v45  }
  0x3c   :  { %270 = vmatpush.msrb.mxu0 %v26_v43  ;;  %233 = vmatmul.f32.vlgmr.msrb.gmra.mxu1 %v581_v16 }
  0x3e   :  { %271 = vmatpush.msrb.mxu0 %v22_v46 }
  0x40   :  { %272 = vmatpush.msrb.mxu0 %v18_v48 }
  0x41   :  { %273 = vmatmul.f32.vlgmr.msrb.gmra.mxu0 %v581_v16 }
  0xaa   :  { %v194_v50 = vpop.f32.mrf.mxu2 }
  0xad   :  { %v127_v49 = vpop.permute.xlu0 %126 }
  0xae   :  { %v195_v51 = vadd.f32 %v194_v50, %v127_v49  ;;  %v214_v52 = vpop.f32.mrf.mxu3 }
  0xb0   :  { %v154_v53 = vpop.f32.mrf.mxu0  ;;  %v174_v54 = vpop.f32.mrf.mxu1  ;;  %v215_v55 = vadd.f32 %v214_v52, %v195_v51 }
  0xb1   :  { %v155_v56 = vadd.f32 %v154_v53, %v127_v49 }
  0xb2   :  { %v301_v57 = vrot.slane %v215_v55, 4 }
  0xb3   :  { %v175_v58 = vadd.f32 %v174_v54, %v155_v56 }
  0xb5   :  { %v304_v59 = vsel %vm303_vm1, %v175_v58, %v301_v57 }
  0xb6   :  { %308 = vst [vmem:[%s690_s3] sm:$0xff] %v304_v59 }
  0xb9   :  { %v234_v60 = vpop.f32.mrf.mxu1 }
  0xba   :  { %v235_v63 = vadd.f32 %v234_v60, %v127_v49 }
  0xbb   :  { %v254_v1 = vpop.f32.mrf.mxu3 }
  0xbc   :  { %v294_v62 = vpop.f32.mrf.mxu2  ;;  %v255_v3 = vadd.f32 %v254_v1, %v235_v63 }
  0xbe   :  { %v274_v61 = vpop.f32.mrf.mxu0 }
  0xbf   :  { %v275_v0 = vadd.f32 %v274_v61, %v127_v49 }
  0xc1   :  { %v295_v2 = vadd.f32 %v294_v62, %v275_v0 }
  0xc3   :  { %v302_v4 = vrot.slane %v295_v2, 4 }
  0xc5   :  { %v305_v5 = vsel %vm303_vm1, %v255_v3, %v302_v4 }
  0xc6   :  { %309 = vst [vmem:[%s690_s3 + $0x8] sm:$0xff] %v305_v5 }

</bundles_post_ra>
